<compile_context>
chip_gen: v7x
topology: tpu7x:2x2x1
jax: 0.10.0
libtpu: 0.0.40
codegen_flags: <defaults>
</compile_context>

<pallas_src>
import jax
import jax.numpy as jnp
from jax.experimental import pallas as pl
from jax.experimental.pallas import tpu as pltpu

EPS = 1e-12  # F.normalize default eps


def _l2norm(v):
    # F.normalize over channel: v / max(||v||_2, eps)
    n = jnp.sqrt(jnp.sum(v * v, axis=-1, keepdims=True))
    return v * pl.reciprocal(jnp.maximum(n, EPS), approx=True)


# ----------------------------------------------------------------------------
# Fused forward kernel: both utils in one invocation.
# scal_i = [unary_bias2, reduce_w[unary], reduce_w[self], reduce_w[cross]] (SMEM)
# wp_i   = (E, 4E) packed projection weights (input-major)
# bp_i   = (1, 4E) packed projection biases
# w2_i   = (1, E)  unary feature_reduce conv weight
# ----------------------------------------------------------------------------
def _atten_kernel(scal0_ref, scal1_ref, x0_ref, x1_ref,
                  wp0_ref, bp0_ref, w2_0_ref,
                  wp1_ref, bp1_ref, w2_1_ref,
                  out0_ref, out1_ref):
    x0 = x0_ref[...]
    x1 = x1_ref[...]

    def project(x3, wp_ref, bp_ref):
        b, s, e = x3.shape
        # One lane-dense matmul for all four 1x1-conv projections of this util.
        h = jnp.dot(x3.reshape(b * s, e), wp_ref[...],
                    preferred_element_type=jnp.float32) + bp_ref[...]
        hu = h[:, 0:e].reshape(b, s, e)                   # unary embed (pre-relu)
        xs = _l2norm(h[:, e:2 * e]).reshape(b, s, e)      # self embed_X, normalized
        ys = _l2norm(h[:, 2 * e:3 * e]).reshape(b, s, e)  # self embed_Y, normalized
        cc = _l2norm(h[:, 3 * e:4 * e]).reshape(b, s, e)  # cross embed,  normalized
        return hu, xs, ys, cc

    hu0, xs0, ys0, cc0 = project(x0, wp0_ref, bp0_ref)
    hu1, xs1, ys1, cc1 = project(x1, wp1_ref, bp1_ref)

    # mean over the sequence of the normalized embeddings (mean-identity trick).
    mean_ys0 = jnp.mean(ys0, axis=1)
    mean_ys1 = jnp.mean(ys1, axis=1)
    mean_cc0 = jnp.mean(cc0, axis=1)
    mean_cc1 = jnp.mean(cc1, axis=1)

    def util_attention(x3, hu, xs, cc, mean_ys, mean_cc_other,
                       w2_ref, scal_ref, out_ref):
        b, s, e = x3.shape
        # Unary: relu -> 1x1 conv to a scalar per position.
        # TODO(synk): F.dropout defaults to training=True in the reference;
        # implemented as identity (eval semantics) since it is stochastic.
        w2 = w2_ref[...].reshape(1, 1, e)
        unary_p = jnp.sum(jnp.maximum(hu, 0.0) * w2, axis=-1) + scal_ref[0]   # (B,S)
        # Self pairwise: mean_y(xn . yn) == xn . mean_y(yn)
        self_p = jnp.sum(xs * mean_ys[:, None, :], axis=-1)                    # (B,S)
        # Cross pairwise: xn . mean(yn of the other util)
        cross_p = jnp.sum(cc * mean_cc_other[:, None, :], axis=-1)             # (B,S)
        # reduce_potentials: 1x1 conv (no bias) over the P=3 axis.
        logits = (scal_ref[1] * unary_p + scal_ref[2] * self_p
                  + scal_ref[3] * cross_p)                                     # (B,S)
        # softmax over S.
        m = jnp.max(logits, axis=1, keepdims=True)
        ex = jnp.exp(logits - m)
        sm = ex * pl.reciprocal(jnp.sum(ex, axis=1, keepdims=True), approx=True)
        # attention: utils^T @ softmax -> (B, E)
        out_ref[...] = jnp.sum(x3 * sm[:, :, None], axis=1)

    util_attention(x0, hu0, xs0, cc0, mean_ys0, mean_cc1, w2_0_ref, scal0_ref, out0_ref)
    util_attention(x1, hu1, xs1, cc1, mean_ys1, mean_cc0, w2_1_ref, scal1_ref, out1_ref)


def atten_forward(utils, params):
    x0, x1 = utils
    B, _, E = x0.shape

    def vmem(shape):
        nd = len(shape)
        return pl.BlockSpec(shape, lambda i, _nd=nd: (0,) * _nd)

    smem = pl.BlockSpec(memory_space=pltpu.MemorySpace.SMEM)

    out0, out1 = pl.pallas_call(
        _atten_kernel,
        grid=(1,),
        in_specs=[smem, smem,
                  vmem(x0.shape), vmem(x1.shape),
                  vmem(params["wp0"].shape), vmem(params["bp0"].shape),
                  vmem(params["w2_0"].shape),
                  vmem(params["wp1"].shape), vmem(params["bp1"].shape),
                  vmem(params["w2_1"].shape)],
        out_specs=(vmem((B, E)), vmem((B, E))),
        out_shape=(jax.ShapeDtypeStruct((B, E), jnp.float32),
                   jax.ShapeDtypeStruct((B, E), jnp.float32)),
        compiler_params=pltpu.CompilerParams(dimension_semantics=("arbitrary",)),
    )(params["scal0"], params["scal1"], x0, x1,
      params["wp0"], params["bp0"], params["w2_0"],
      params["wp1"], params["bp1"], params["w2_1"])
    return [out0, out1]


# ----------------------------------------------------------------------------
# Parameter construction (deterministic) + packing for the fused kernel.
# ----------------------------------------------------------------------------
def _init_conv1d(key, out_c, in_c, bias=True):
    k1, k2 = jax.random.split(key)
    bound = 1.0 / jnp.sqrt(jnp.float32(in_c))
    w = jax.random.uniform(k1, (out_c, in_c), jnp.float32, -bound, bound)
    b = jax.random.uniform(k2, (out_c,), jnp.float32, -bound, bound) if bias else None
    return w, b


def build_atten_params(key, util_e):
    n = len(util_e)
    assert n == 2 and util_e[0] == util_e[1], \
        "the reference cross-Pairwise requires equal util embed sizes"
    E = util_e[0]
    keys = iter(jax.random.split(key, 64))

    raw = {}
    for i in range(n):  # Unary(e): Conv1d(e,e,1), Conv1d(e,1,1)
        raw[f"un_w1_{i}"], raw[f"un_b1_{i}"] = _init_conv1d(next(keys), E, E)
        raw[f"un_w2_{i}"], raw[f"un_b2_{i}"] = _init_conv1d(next(keys), 1, E)
    for i in range(n):  # self Pairwise(e): embed_X / embed_Y Conv1d(e, E, 1)
        raw[f"self_wx_{i}"], raw[f"self_bx_{i}"] = _init_conv1d(next(keys), E, E)
        raw[f"self_wy_{i}"], raw[f"self_by_{i}"] = _init_conv1d(next(keys), E, E)
    # cross Pairwise(e0, None, e1, None): embed_Y uses in_channels = e0 (torch code)
    raw["cross_wx"], raw["cross_bx"] = _init_conv1d(next(keys), E, util_e[0])
    raw["cross_wy"], raw["cross_by"] = _init_conv1d(next(keys), E, util_e[0])
    for i in range(n):  # reduce_potentials: Conv1d(P=3, 1, 1, bias=False)
        raw[f"red_{i}"], _ = _init_conv1d(next(keys), 1, 3, bias=False)

    # Pack per-util lane-dense projection weights, pre-transposed to (in, out).
    def pack(i, cross_w, cross_b):
        wp = jnp.concatenate([raw[f"un_w1_{i}"].T, raw[f"self_wx_{i}"].T,
                              raw[f"self_wy_{i}"].T, cross_w.T], axis=1)   # (E, 4E)
        bp = jnp.concatenate([raw[f"un_b1_{i}"], raw[f"self_bx_{i}"],
                              raw[f"self_by_{i}"], cross_b]).reshape(1, 4 * E)
        return wp, bp

    wp0, bp0 = pack(0, raw["cross_wx"], raw["cross_bx"])   # util 0 is the cross "X" side
    wp1, bp1 = pack(1, raw["cross_wy"], raw["cross_by"])   # util 1 is the cross "Y" side

    params = {
        "wp0": wp0, "bp0": bp0, "w2_0": raw["un_w2_0"],
        "wp1": wp1, "bp1": bp1, "w2_1": raw["un_w2_1"],
        # SMEM scalars: [unary bias2, red_w[unary], red_w[self], red_w[cross]]
        "scal0": jnp.concatenate([raw["un_b2_0"], raw["red_0"].reshape(-1)]),
        "scal1": jnp.concatenate([raw["un_b2_1"], raw["red_1"].reshape(-1)]),
        "raw": raw,
    }
    return params


# ----------------------------------------------------------------------------
# Pure-JAX reference (mirrors the PyTorch module, explicit SxS similarity).
# ----------------------------------------------------------------------------
def _ref_forward(utils, raw):
    def embed(x, w, b):                       # 1x1 Conv1d in (B,S,C) layout
        return x @ w.T + b

    def l2n(x):
        n = jnp.sqrt(jnp.sum(x * x, axis=-1, keepdims=True))
        return x / jnp.maximum(n, EPS)

    def pairwise(x, y, wx, bx, wy, by):
        xn = l2n(embed(x, wx, bx))
        yn = l2n(embed(y, wy, by))
        s = jnp.einsum("bxe,bye->bxy", xn, yn)
        return s.mean(axis=2), s.mean(axis=1)

    pots = {0: [], 1: []}
    for i in range(2):
        x = utils[i]
        h = jnp.maximum(embed(x, raw[f"un_w1_{i}"], raw[f"un_b1_{i}"]), 0.0)
        pots[i].append((h @ raw[f"un_w2_{i}"].T)[..., 0] + raw[f"un_b2_{i}"][0])
        sp, _ = pairwise(x, x, raw[f"self_wx_{i}"], raw[f"self_bx_{i}"],
                         raw[f"self_wy_{i}"], raw[f"self_by_{i}"])
        pots[i].append(sp)
    p01, p10 = pairwise(utils[0], utils[1], raw["cross_wx"], raw["cross_bx"],
                        raw["cross_wy"], raw["cross_by"])
    pots[0].append(p01)
    pots[1].append(p10)

    outs = []
    for i in range(2):
        pot = jnp.stack(pots[i], axis=1)                          # (B, 3, S)
        logits = jnp.einsum("bps,p->bs", pot, raw[f"red_{i}"][0])
        sm = jax.nn.softmax(logits, axis=1)
        outs.append(jnp.einsum("bse,bs->be", utils[i], sm))
    return outs


if __name__ == "__main__":
    B = 2
    util_e = [32, 32]      # equal sizes required by the reference cross-Pairwise
    seqs = [8, 16]

    key = jax.random.PRNGKey(0)
    k_in0, k_in1, k_par = jax.random.split(key, 3)
    utils = [
        jax.random.normal(k_in0, (B, seqs[0], util_e[0]), jnp.float32),
        jax.random.normal(k_in1, (B, seqs[1], util_e[1]), jnp.float32),
    ]
    params = build_atten_params(k_par, util_e)

    attention = atten_forward(utils, params)
    attention = jax.block_until_ready(attention)

    assert attention[0].shape == (B, util_e[0])
    assert attention[1].shape == (B, util_e[1])
    assert all(bool(jnp.all(jnp.isfinite(a))) for a in attention)

    # Tolerance-based check against the explicit (SxS-matrix) reference; loose
    # bounds because the kernel uses approx reciprocals (EUP) and the exact
    # mean-of-dot == dot-of-mean identity changes rounding slightly.
    ref = _ref_forward(utils, params["raw"])
    for a, r in zip(attention, ref):
        assert bool(jnp.allclose(a, r, rtol=2e-2, atol=2e-2))

    print("KERNEL_OK")
</pallas_src>

<mosaic_0001>
module attributes {stable_mosaic.version = 11 : i64} {
  func.func @_atten_kernel(%arg0: i32, %arg1: memref<4xf32, #tpu.memory_space<smem>>, %arg2: memref<4xf32, #tpu.memory_space<smem>>, %arg3: memref<2x8x32xf32, #tpu.memory_space<vmem>>, %arg4: memref<2x16x32xf32, #tpu.memory_space<vmem>>, %arg5: memref<32x128xf32, #tpu.memory_space<vmem>>, %arg6: memref<1x128xf32, #tpu.memory_space<vmem>>, %arg7: memref<1x32xf32, #tpu.memory_space<vmem>>, %arg8: memref<32x128xf32, #tpu.memory_space<vmem>>, %arg9: memref<1x128xf32, #tpu.memory_space<vmem>>, %arg10: memref<1x32xf32, #tpu.memory_space<vmem>>, %arg11: memref<2x32xf32, #tpu.memory_space<vmem>>, %arg12: memref<2x32xf32, #tpu.memory_space<vmem>>) attributes {dimension_semantics = [#tpu.dimension_semantics<arbitrary>], iteration_bounds = array<i64: 1>, scalar_prefetch = 0 : i64, scratch_operands = 0 : i64, tpu.core_type = #tpu.core_type<tc>, window_params = [{transform_indices = @transform_0, window_bounds = array<i64: 4>}, {transform_indices = @transform_1, window_bounds = array<i64: 4>}, {pipeline_mode = #tpu.pipeline_mode<synchronous>, transform_indices = @transform_2, window_bounds = array<i64: 2, 8, 32>}, {pipeline_mode = #tpu.pipeline_mode<synchronous>, transform_indices = @transform_3, window_bounds = array<i64: 2, 16, 32>}, {pipeline_mode = #tpu.pipeline_mode<synchronous>, transform_indices = @transform_4, window_bounds = array<i64: 32, 128>}, {pipeline_mode = #tpu.pipeline_mode<synchronous>, transform_indices = @transform_5, window_bounds = array<i64: 1, 128>}, {pipeline_mode = #tpu.pipeline_mode<synchronous>, transform_indices = @transform_6, window_bounds = array<i64: 1, 32>}, {pipeline_mode = #tpu.pipeline_mode<synchronous>, transform_indices = @transform_7, window_bounds = array<i64: 32, 128>}, {pipeline_mode = #tpu.pipeline_mode<synchronous>, transform_indices = @transform_8, window_bounds = array<i64: 1, 128>}, {pipeline_mode = #tpu.pipeline_mode<synchronous>, transform_indices = @transform_9, window_bounds = array<i64: 1, 32>}, {pipeline_mode = #tpu.pipeline_mode<synchronous>, transform_indices = @transform_10, window_bounds = array<i64: 2, 32>}, {pipeline_mode = #tpu.pipeline_mode<synchronous>, transform_indices = @transform_11, window_bounds = array<i64: 2, 32>}]} {
    %c0 = arith.constant 0 : index
    %c0_0 = arith.constant 0 : index
    %c0_1 = arith.constant 0 : index
    %0 = vector.load %arg3[%c0, %c0_0, %c0_1] : memref<2x8x32xf32, #tpu.memory_space<vmem>>, vector<2x8x32xf32>
    %c0_2 = arith.constant 0 : index
    %c0_3 = arith.constant 0 : index
    %c0_4 = arith.constant 0 : index
    %1 = vector.load %arg4[%c0_2, %c0_3, %c0_4] : memref<2x16x32xf32, #tpu.memory_space<vmem>>, vector<2x16x32xf32>
    %2 = vector.shape_cast %0 : vector<2x8x32xf32> to vector<16x32xf32>
    %c0_5 = arith.constant 0 : index
    %c0_6 = arith.constant 0 : index
    %3 = vector.load %arg5[%c0_5, %c0_6] : memref<32x128xf32, #tpu.memory_space<vmem>>, vector<32x128xf32>
    %cst = arith.constant dense<0.000000e+00> : vector<16x128xf32>
    %4 = tpu.matmul %2, %3, %cst {dimension_numbers = #tpu.dot_dimension_numbers<[1], [0], [0], [1], [0, 0, 1, 1], [], []>} : vector<16x32xf32>, vector<32x128xf32>, vector<16x128xf32> -> vector<16x128xf32>
    %c0_7 = arith.constant 0 : index
    %c0_8 = arith.constant 0 : index
    %5 = vector.load %arg6[%c0_7, %c0_8] : memref<1x128xf32, #tpu.memory_space<vmem>>, vector<1x128xf32>
    %6 = vector.broadcast %5 : vector<1x128xf32> to vector<16x128xf32>
    %7 = arith.addf %4, %6 : vector<16x128xf32>
    %8 = vector.extract_strided_slice %7 {offsets = [0, 0], sizes = [16, 32], strides = [1, 1]} : vector<16x128xf32> to vector<16x32xf32>
    %9 = vector.shape_cast %8 : vector<16x32xf32> to vector<2x8x32xf32>
    %10 = vector.extract_strided_slice %7 {offsets = [0, 32], sizes = [16, 32], strides = [1, 1]} : vector<16x128xf32> to vector<16x32xf32>
    %11 = arith.mulf %10, %10 : vector<16x32xf32>
    %cst_9 = arith.constant dense<0.000000e+00> : vector<16xf32>
    %12 = vector.multi_reduction <add>, %11, %cst_9 [1] : vector<16x32xf32> to vector<16xf32>
    %13 = vector.shape_cast %12 : vector<16xf32> to vector<16x1xf32>
    %14 = math.sqrt %13 : vector<16x1xf32>
    %cst_10 = arith.constant 9.99999996E-13 : f32
    %15 = vector.broadcast %cst_10 : f32 to vector<16x1xf32>
    %16 = arith.maximumf %14, %15 : vector<16x1xf32>
    %17 = tpu.reciprocal %16 {approx = true} : vector<16x1xf32> -> vector<16x1xf32>
    %18 = vector.broadcast %17 : vector<16x1xf32> to vector<16x32xf32>
    %19 = arith.mulf %10, %18 : vector<16x32xf32>
    %20 = vector.shape_cast %19 : vector<16x32xf32> to vector<2x8x32xf32>
    %21 = vector.extract_strided_slice %7 {offsets = [0, 64], sizes = [16, 32], strides = [1, 1]} : vector<16x128xf32> to vector<16x32xf32>
    %22 = arith.mulf %21, %21 : vector<16x32xf32>
    %cst_11 = arith.constant dense<0.000000e+00> : vector<16xf32>
    %23 = vector.multi_reduction <add>, %22, %cst_11 [1] : vector<16x32xf32> to vector<16xf32>
    %24 = vector.shape_cast %23 : vector<16xf32> to vector<16x1xf32>
    %25 = math.sqrt %24 : vector<16x1xf32>
    %cst_12 = arith.constant 9.99999996E-13 : f32
    %26 = vector.broadcast %cst_12 : f32 to vector<16x1xf32>
    %27 = arith.maximumf %25, %26 : vector<16x1xf32>
    %28 = tpu.reciprocal %27 {approx = true} : vector<16x1xf32> -> vector<16x1xf32>
    %29 = vector.broadcast %28 : vector<16x1xf32> to vector<16x32xf32>
    %30 = arith.mulf %21, %29 : vector<16x32xf32>
    %31 = vector.shape_cast %30 : vector<16x32xf32> to vector<2x8x32xf32>
    %32 = vector.extract_strided_slice %7 {offsets = [0, 96], sizes = [16, 32], strides = [1, 1]} : vector<16x128xf32> to vector<16x32xf32>
    %33 = arith.mulf %32, %32 : vector<16x32xf32>
    %cst_13 = arith.constant dense<0.000000e+00> : vector<16xf32>
    %34 = vector.multi_reduction <add>, %33, %cst_13 [1] : vector<16x32xf32> to vector<16xf32>
    %35 = vector.shape_cast %34 : vector<16xf32> to vector<16x1xf32>
    %36 = math.sqrt %35 : vector<16x1xf32>
    %cst_14 = arith.constant 9.99999996E-13 : f32
    %37 = vector.broadcast %cst_14 : f32 to vector<16x1xf32>
    %38 = arith.maximumf %36, %37 : vector<16x1xf32>
    %39 = tpu.reciprocal %38 {approx = true} : vector<16x1xf32> -> vector<16x1xf32>
    %40 = vector.broadcast %39 : vector<16x1xf32> to vector<16x32xf32>
    %41 = arith.mulf %32, %40 : vector<16x32xf32>
    %42 = vector.shape_cast %41 : vector<16x32xf32> to vector<2x8x32xf32>
    %43 = vector.shape_cast %1 : vector<2x16x32xf32> to vector<32x32xf32>
    %c0_15 = arith.constant 0 : index
    %c0_16 = arith.constant 0 : index
    %44 = vector.load %arg8[%c0_15, %c0_16] : memref<32x128xf32, #tpu.memory_space<vmem>>, vector<32x128xf32>
    %cst_17 = arith.constant dense<0.000000e+00> : vector<32x128xf32>
    %45 = tpu.matmul %43, %44, %cst_17 {dimension_numbers = #tpu.dot_dimension_numbers<[1], [0], [0], [1], [0, 0, 1, 1], [], []>} : vector<32x32xf32>, vector<32x128xf32>, vector<32x128xf32> -> vector<32x128xf32>
    %c0_18 = arith.constant 0 : index
    %c0_19 = arith.constant 0 : index
    %46 = vector.load %arg9[%c0_18, %c0_19] : memref<1x128xf32, #tpu.memory_space<vmem>>, vector<1x128xf32>
    %47 = vector.broadcast %46 : vector<1x128xf32> to vector<32x128xf32>
    %48 = arith.addf %45, %47 : vector<32x128xf32>
    %49 = vector.extract_strided_slice %48 {offsets = [0, 0], sizes = [32, 32], strides = [1, 1]} : vector<32x128xf32> to vector<32x32xf32>
    %50 = vector.shape_cast %49 : vector<32x32xf32> to vector<2x16x32xf32>
    %51 = vector.extract_strided_slice %48 {offsets = [0, 32], sizes = [32, 32], strides = [1, 1]} : vector<32x128xf32> to vector<32x32xf32>
    %52 = arith.mulf %51, %51 : vector<32x32xf32>
    %cst_20 = arith.constant dense<0.000000e+00> : vector<32xf32>
    %53 = vector.multi_reduction <add>, %52, %cst_20 [1] : vector<32x32xf32> to vector<32xf32>
    %54 = vector.shape_cast %53 : vector<32xf32> to vector<32x1xf32>
    %55 = math.sqrt %54 : vector<32x1xf32>
    %cst_21 = arith.constant 9.99999996E-13 : f32
    %56 = vector.broadcast %cst_21 : f32 to vector<32x1xf32>
    %57 = arith.maximumf %55, %56 : vector<32x1xf32>
    %58 = tpu.reciprocal %57 {approx = true} : vector<32x1xf32> -> vector<32x1xf32>
    %59 = vector.broadcast %58 : vector<32x1xf32> to vector<32x32xf32>
    %60 = arith.mulf %51, %59 : vector<32x32xf32>
    %61 = vector.shape_cast %60 : vector<32x32xf32> to vector<2x16x32xf32>
    %62 = vector.extract_strided_slice %48 {offsets = [0, 64], sizes = [32, 32], strides = [1, 1]} : vector<32x128xf32> to vector<32x32xf32>
    %63 = arith.mulf %62, %62 : vector<32x32xf32>
    %cst_22 = arith.constant dense<0.000000e+00> : vector<32xf32>
    %64 = vector.multi_reduction <add>, %63, %cst_22 [1] : vector<32x32xf32> to vector<32xf32>
    %65 = vector.shape_cast %64 : vector<32xf32> to vector<32x1xf32>
    %66 = math.sqrt %65 : vector<32x1xf32>
    %cst_23 = arith.constant 9.99999996E-13 : f32
    %67 = vector.broadcast %cst_23 : f32 to vector<32x1xf32>
    %68 = arith.maximumf %66, %67 : vector<32x1xf32>
    %69 = tpu.reciprocal %68 {approx = true} : vector<32x1xf32> -> vector<32x1xf32>
    %70 = vector.broadcast %69 : vector<32x1xf32> to vector<32x32xf32>
    %71 = arith.mulf %62, %70 : vector<32x32xf32>
    %72 = vector.shape_cast %71 : vector<32x32xf32> to vector<2x16x32xf32>
    %73 = vector.extract_strided_slice %48 {offsets = [0, 96], sizes = [32, 32], strides = [1, 1]} : vector<32x128xf32> to vector<32x32xf32>
    %74 = arith.mulf %73, %73 : vector<32x32xf32>
    %cst_24 = arith.constant dense<0.000000e+00> : vector<32xf32>
    %75 = vector.multi_reduction <add>, %74, %cst_24 [1] : vector<32x32xf32> to vector<32xf32>
    %76 = vector.shape_cast %75 : vector<32xf32> to vector<32x1xf32>
    %77 = math.sqrt %76 : vector<32x1xf32>
    %cst_25 = arith.constant 9.99999996E-13 : f32
    %78 = vector.broadcast %cst_25 : f32 to vector<32x1xf32>
    %79 = arith.maximumf %77, %78 : vector<32x1xf32>
    %80 = tpu.reciprocal %79 {approx = true} : vector<32x1xf32> -> vector<32x1xf32>
    %81 = vector.broadcast %80 : vector<32x1xf32> to vector<32x32xf32>
    %82 = arith.mulf %73, %81 : vector<32x32xf32>
    %83 = vector.shape_cast %82 : vector<32x32xf32> to vector<2x16x32xf32>
    %cst_26 = arith.constant dense<0.000000e+00> : vector<2x32xf32>
    %84 = vector.multi_reduction <add>, %31, %cst_26 [1] : vector<2x8x32xf32> to vector<2x32xf32>
    %cst_27 = arith.constant 8.000000e+00 : f32
    %85 = vector.broadcast %cst_27 : f32 to vector<2x32xf32>
    %86 = arith.divf %84, %85 : vector<2x32xf32>
    %cst_28 = arith.constant dense<0.000000e+00> : vector<2x32xf32>
    %87 = vector.multi_reduction <add>, %72, %cst_28 [1] : vector<2x16x32xf32> to vector<2x32xf32>
    %cst_29 = arith.constant 1.600000e+01 : f32
    %88 = vector.broadcast %cst_29 : f32 to vector<2x32xf32>
    %89 = arith.divf %87, %88 : vector<2x32xf32>
    %cst_30 = arith.constant dense<0.000000e+00> : vector<2x32xf32>
    %90 = vector.multi_reduction <add>, %42, %cst_30 [1] : vector<2x8x32xf32> to vector<2x32xf32>
    %cst_31 = arith.constant 8.000000e+00 : f32
    %91 = vector.broadcast %cst_31 : f32 to vector<2x32xf32>
    %92 = arith.divf %90, %91 : vector<2x32xf32>
    %cst_32 = arith.constant dense<0.000000e+00> : vector<2x32xf32>
    %93 = vector.multi_reduction <add>, %83, %cst_32 [1] : vector<2x16x32xf32> to vector<2x32xf32>
    %cst_33 = arith.constant 1.600000e+01 : f32
    %94 = vector.broadcast %cst_33 : f32 to vector<2x32xf32>
    %95 = arith.divf %93, %94 : vector<2x32xf32>
    %c0_34 = arith.constant 0 : index
    %c0_35 = arith.constant 0 : index
    %96 = vector.load %arg7[%c0_34, %c0_35] : memref<1x32xf32, #tpu.memory_space<vmem>>, vector<1x32xf32>
    %97 = vector.shape_cast %96 : vector<1x32xf32> to vector<1x1x32xf32>
    %cst_36 = arith.constant 0.000000e+00 : f32
    %98 = vector.broadcast %cst_36 : f32 to vector<2x8x32xf32>
    %99 = arith.maximumf %9, %98 : vector<2x8x32xf32>
    %100 = vector.broadcast %97 : vector<1x1x32xf32> to vector<2x8x32xf32>
    %101 = arith.mulf %99, %100 : vector<2x8x32xf32>
    %cst_37 = arith.constant dense<0.000000e+00> : vector<2x8xf32>
    %102 = vector.multi_reduction <add>, %101, %cst_37 [2] : vector<2x8x32xf32> to vector<2x8xf32>
    %c0_38 = arith.constant 0 : index
    %103 = memref.load %arg1[%c0_38] : memref<4xf32, #tpu.memory_space<smem>>
    %104 = vector.broadcast %103 : f32 to vector<2x8xf32>
    %105 = arith.addf %102, %104 : vector<2x8xf32>
    %106 = vector.shape_cast %86 : vector<2x32xf32> to vector<2x1x32xf32>
    %107 = vector.broadcast %106 : vector<2x1x32xf32> to vector<2x8x32xf32>
    %108 = arith.mulf %20, %107 : vector<2x8x32xf32>
    %cst_39 = arith.constant dense<0.000000e+00> : vector<2x8xf32>
    %109 = vector.multi_reduction <add>, %108, %cst_39 [2] : vector<2x8x32xf32> to vector<2x8xf32>
    %110 = vector.shape_cast %95 : vector<2x32xf32> to vector<2x1x32xf32>
    %111 = vector.broadcast %110 : vector<2x1x32xf32> to vector<2x8x32xf32>
    %112 = arith.mulf %42, %111 : vector<2x8x32xf32>
    %cst_40 = arith.constant dense<0.000000e+00> : vector<2x8xf32>
    %113 = vector.multi_reduction <add>, %112, %cst_40 [2] : vector<2x8x32xf32> to vector<2x8xf32>
    %c1 = arith.constant 1 : index
    %114 = memref.load %arg1[%c1] : memref<4xf32, #tpu.memory_space<smem>>
    %115 = vector.broadcast %114 : f32 to vector<2x8xf32>
    %116 = arith.mulf %115, %105 : vector<2x8xf32>
    %c2 = arith.constant 2 : index
    %117 = memref.load %arg1[%c2] : memref<4xf32, #tpu.memory_space<smem>>
    %118 = vector.broadcast %117 : f32 to vector<2x8xf32>
    %119 = arith.mulf %118, %109 : vector<2x8xf32>
    %120 = arith.addf %116, %119 : vector<2x8xf32>
    %c3 = arith.constant 3 : index
    %121 = memref.load %arg1[%c3] : memref<4xf32, #tpu.memory_space<smem>>
    %122 = vector.broadcast %121 : f32 to vector<2x8xf32>
    %123 = arith.mulf %122, %113 : vector<2x8xf32>
    %124 = arith.addf %120, %123 : vector<2x8xf32>
    %cst_41 = arith.constant dense<0xFF800000> : vector<2xf32>
    %125 = vector.multi_reduction <maximumf>, %124, %cst_41 [1] : vector<2x8xf32> to vector<2xf32>
    %126 = vector.shape_cast %125 : vector<2xf32> to vector<2x1xf32>
    %127 = vector.broadcast %126 : vector<2x1xf32> to vector<2x8xf32>
    %128 = arith.subf %124, %127 : vector<2x8xf32>
    %129 = math.exp %128 : vector<2x8xf32>
    %cst_42 = arith.constant dense<0.000000e+00> : vector<2xf32>
    %130 = vector.multi_reduction <add>, %129, %cst_42 [1] : vector<2x8xf32> to vector<2xf32>
    %131 = vector.shape_cast %130 : vector<2xf32> to vector<2x1xf32>
    %132 = tpu.reciprocal %131 {approx = true} : vector<2x1xf32> -> vector<2x1xf32>
    %133 = vector.broadcast %132 : vector<2x1xf32> to vector<2x8xf32>
    %134 = arith.mulf %129, %133 : vector<2x8xf32>
    %135 = vector.shape_cast %134 : vector<2x8xf32> to vector<2x8x1xf32>
    %136 = vector.broadcast %135 : vector<2x8x1xf32> to vector<2x8x32xf32>
    %137 = arith.mulf %0, %136 : vector<2x8x32xf32>
    %cst_43 = arith.constant dense<0.000000e+00> : vector<2x32xf32>
    %138 = vector.multi_reduction <add>, %137, %cst_43 [1] : vector<2x8x32xf32> to vector<2x32xf32>
    %c0_44 = arith.constant 0 : index
    %c0_45 = arith.constant 0 : index
    %139 = vector.load %arg11[%c0_44, %c0_45] : memref<2x32xf32, #tpu.memory_space<vmem>>, vector<2x32xf32>
    tpu.vector_store %arg11[%c0_44, %c0_45], %138 {strides = array<i32>} : memref<2x32xf32, #tpu.memory_space<vmem>>, vector<2x32xf32>,
    %c0_46 = arith.constant 0 : index
    %c0_47 = arith.constant 0 : index
    %140 = vector.load %arg10[%c0_46, %c0_47] : memref<1x32xf32, #tpu.memory_space<vmem>>, vector<1x32xf32>
    %141 = vector.shape_cast %140 : vector<1x32xf32> to vector<1x1x32xf32>
    %cst_48 = arith.constant 0.000000e+00 : f32
    %142 = vector.broadcast %cst_48 : f32 to vector<2x16x32xf32>
    %143 = arith.maximumf %50, %142 : vector<2x16x32xf32>
    %144 = vector.broadcast %141 : vector<1x1x32xf32> to vector<2x16x32xf32>
    %145 = arith.mulf %143, %144 : vector<2x16x32xf32>
    %cst_49 = arith.constant dense<0.000000e+00> : vector<2x16xf32>
    %146 = vector.multi_reduction <add>, %145, %cst_49 [2] : vector<2x16x32xf32> to vector<2x16xf32>
    %c0_50 = arith.constant 0 : index
    %147 = memref.load %arg2[%c0_50] : memref<4xf32, #tpu.memory_space<smem>>
    %148 = vector.broadcast %147 : f32 to vector<2x16xf32>
    %149 = arith.addf %146, %148 : vector<2x16xf32>
    %150 = vector.shape_cast %89 : vector<2x32xf32> to vector<2x1x32xf32>
    %151 = vector.broadcast %150 : vector<2x1x32xf32> to vector<2x16x32xf32>
    %152 = arith.mulf %61, %151 : vector<2x16x32xf32>
    %cst_51 = arith.constant dense<0.000000e+00> : vector<2x16xf32>
    %153 = vector.multi_reduction <add>, %152, %cst_51 [2] : vector<2x16x32xf32> to vector<2x16xf32>
    %154 = vector.shape_cast %92 : vector<2x32xf32> to vector<2x1x32xf32>
    %155 = vector.broadcast %154 : vector<2x1x32xf32> to vector<2x16x32xf32>
    %156 = arith.mulf %83, %155 : vector<2x16x32xf32>
    %cst_52 = arith.constant dense<0.000000e+00> : vector<2x16xf32>
    %157 = vector.multi_reduction <add>, %156, %cst_52 [2] : vector<2x16x32xf32> to vector<2x16xf32>
    %c1_53 = arith.constant 1 : index
    %158 = memref.load %arg2[%c1_53] : memref<4xf32, #tpu.memory_space<smem>>
    %159 = vector.broadcast %158 : f32 to vector<2x16xf32>
    %160 = arith.mulf %159, %149 : vector<2x16xf32>
    %c2_54 = arith.constant 2 : index
    %161 = memref.load %arg2[%c2_54] : memref<4xf32, #tpu.memory_space<smem>>
    %162 = vector.broadcast %161 : f32 to vector<2x16xf32>
    %163 = arith.mulf %162, %153 : vector<2x16xf32>
    %164 = arith.addf %160, %163 : vector<2x16xf32>
    %c3_55 = arith.constant 3 : index
    %165 = memref.load %arg2[%c3_55] : memref<4xf32, #tpu.memory_space<smem>>
    %166 = vector.broadcast %165 : f32 to vector<2x16xf32>
    %167 = arith.mulf %166, %157 : vector<2x16xf32>
    %168 = arith.addf %164, %167 : vector<2x16xf32>
    %cst_56 = arith.constant dense<0xFF800000> : vector<2xf32>
    %169 = vector.multi_reduction <maximumf>, %168, %cst_56 [1] : vector<2x16xf32> to vector<2xf32>
    %170 = vector.shape_cast %169 : vector<2xf32> to vector<2x1xf32>
    %171 = vector.broadcast %170 : vector<2x1xf32> to vector<2x16xf32>
    %172 = arith.subf %168, %171 : vector<2x16xf32>
    %173 = math.exp %172 : vector<2x16xf32>
    %cst_57 = arith.constant dense<0.000000e+00> : vector<2xf32>
    %174 = vector.multi_reduction <add>, %173, %cst_57 [1] : vector<2x16xf32> to vector<2xf32>
    %175 = vector.shape_cast %174 : vector<2xf32> to vector<2x1xf32>
    %176 = tpu.reciprocal %175 {approx = true} : vector<2x1xf32> -> vector<2x1xf32>
    %177 = vector.broadcast %176 : vector<2x1xf32> to vector<2x16xf32>
    %178 = arith.mulf %173, %177 : vector<2x16xf32>
    %179 = vector.shape_cast %178 : vector<2x16xf32> to vector<2x16x1xf32>
    %180 = vector.broadcast %179 : vector<2x16x1xf32> to vector<2x16x32xf32>
    %181 = arith.mulf %1, %180 : vector<2x16x32xf32>
    %cst_58 = arith.constant dense<0.000000e+00> : vector<2x32xf32>
    %182 = vector.multi_reduction <add>, %181, %cst_58 [1] : vector<2x16x32xf32> to vector<2x32xf32>
    %c0_59 = arith.constant 0 : index
    %c0_60 = arith.constant 0 : index
    %183 = vector.load %arg12[%c0_59, %c0_60] : memref<2x32xf32, #tpu.memory_space<vmem>>, vector<2x32xf32>
    tpu.vector_store %arg12[%c0_59, %c0_60], %182 {strides = array<i32>} : memref<2x32xf32, #tpu.memory_space<vmem>>, vector<2x32xf32>,
    return
  }
  func.func @transform_0(%arg0: i32) -> i32 {
    %c0_i32 = arith.constant 0 : i32
    %c0_i32_0 = arith.constant 0 : i32
    return %c0_i32 : i32
  }
  func.func @transform_1(%arg0: i32) -> i32 {
    %c0_i32 = arith.constant 0 : i32
    %c0_i32_0 = arith.constant 0 : i32
    return %c0_i32 : i32
  }
  func.func @transform_2(%arg0: i32) -> (i32, i32, i32) {
    %c0_i32 = arith.constant 0 : i32
    %c0_i32_0 = arith.constant 0 : i32
    %c0_i32_1 = arith.constant 0 : i32
    %c0_i32_2 = arith.constant 0 : i32
    return %c0_i32, %c0_i32_0, %c0_i32_1 : i32, i32, i32
  }
  func.func @transform_3(%arg0: i32) -> (i32, i32, i32) {
    %c0_i32 = arith.constant 0 : i32
    %c0_i32_0 = arith.constant 0 : i32
    %c0_i32_1 = arith.constant 0 : i32
    %c0_i32_2 = arith.constant 0 : i32
    return %c0_i32, %c0_i32_0, %c0_i32_1 : i32, i32, i32
  }
  func.func @transform_4(%arg0: i32) -> (i32, i32) {
    %c0_i32 = arith.constant 0 : i32
    %c0_i32_0 = arith.constant 0 : i32
    %c0_i32_1 = arith.constant 0 : i32
    return %c0_i32, %c0_i32_0 : i32, i32
  }
  func.func @transform_5(%arg0: i32) -> (i32, i32) {
    %c0_i32 = arith.constant 0 : i32
    %c0_i32_0 = arith.constant 0 : i32
    %c0_i32_1 = arith.constant 0 : i32
    return %c0_i32, %c0_i32_0 : i32, i32
  }
  func.func @transform_6(%arg0: i32) -> (i32, i32) {
    %c0_i32 = arith.constant 0 : i32
    %c0_i32_0 = arith.constant 0 : i32
    %c0_i32_1 = arith.constant 0 : i32
    return %c0_i32, %c0_i32_0 : i32, i32
  }
  func.func @transform_7(%arg0: i32) -> (i32, i32) {
    %c0_i32 = arith.constant 0 : i32
    %c0_i32_0 = arith.constant 0 : i32
    %c0_i32_1 = arith.constant 0 : i32
    return %c0_i32, %c0_i32_0 : i32, i32
  }
  func.func @transform_8(%arg0: i32) -> (i32, i32) {
    %c0_i32 = arith.constant 0 : i32
    %c0_i32_0 = arith.constant 0 : i32
    %c0_i32_1 = arith.constant 0 : i32
    return %c0_i32, %c0_i32_0 : i32, i32
  }
  func.func @transform_9(%arg0: i32) -> (i32, i32) {
    %c0_i32 = arith.constant 0 : i32
    %c0_i32_0 = arith.constant 0 : i32
    %c0_i32_1 = arith.constant 0 : i32
    return %c0_i32, %c0_i32_0 : i32, i32
  }
  func.func @transform_10(%arg0: i32) -> (i32, i32) {
    %c0_i32 = arith.constant 0 : i32
    %c0_i32_0 = arith.constant 0 : i32
    %c0_i32_1 = arith.constant 0 : i32
    return %c0_i32, %c0_i32_0 : i32, i32
  }
  func.func @transform_11(%arg0: i32) -> (i32, i32) {
    %c0_i32 = arith.constant 0 : i32
    %c0_i32_0 = arith.constant 0 : i32
    %c0_i32_1 = arith.constant 0 : i32
    return %c0_i32, %c0_i32_0 : i32, i32
  }
}

</mosaic_0001>

<bundles_post_ra>
// kernel: tpu_custom_call.1
= control target key start
LH: loop header
LB: loop body
LE: loop exit
PB: predicated region body
PF: predicated region fallthrough
CT: control target
= control target key end

     0   :  { %17 = vsyncpa [#allocation5], 0  ;;  %s1968_s0 = inlined_call_operand.hbm [shape: f32[4], index: 0, kind: input, shape index: {}]   ;;  %s1969_s1 = inlined_call_operand.vmem [shape: f32[4], index: 1, kind: input, shape index: {}]   ;;  %s1970_s2 = inlined_call_operand.hbm [shape: f32[2,8,32], index: 2, kind: input, shape index: {}]   ;;  %s1971_s3 = inlined_call_operand.hbm [shape: f32[2,16,32], index: 3, kind: input, shape index: {}]   ;;  %s1972_s4 = inlined_call_operand.hbm [shape: f32[32,128], index: 4, kind: input, shape index: {}]   ;;  %s1973_s5 = inlined_call_operand.vmem [shape: f32[1,128], index: 5, kind: input, shape index: {}]   ;;  %s1974_s6 = inlined_call_operand.vmem [shape: f32[1,32], index: 6, kind: input, shape index: {}]   ;;  %s1975_s7 = inlined_call_operand.hbm [shape: f32[32,128], index: 7, kind: input, shape index: {}]   ;;  %s1976_s8 = inlined_call_operand.vmem [shape: f32[1,128], index: 8, kind: input, shape index: {}]   ;;  %s1977_s9 = inlined_call_operand.vmem [shape: f32[1,32], index: 9, kind: input, shape index: {}]   ;;  %s1978_s10 = inlined_call_operand.hbm [shape: f32[2,32], index: 10, kind: output, shape index: {0}]   ;;  %s1979_s11 = inlined_call_operand.hbm [shape: f32[2,32], index: 11, kind: output, shape index: {1}]  }
   0x1   :  { %18 = vsyncpa [#allocation6], 0 }
   0x2   :  { %19 = vsyncpa [#allocation3], 0 }
   0x3   :  { %20 = vsyncpa [#allocation10], 0 }
   0x4   :  { %21 = vsyncpa [#allocation13], 0 }
   0x5   :  { %22 = vsyncpa [#allocation4], 0 }
   0x6   :  { %23 = vsyncpa [#allocation16], 0  ;;  %s1548_s17 = smov [#allocation9]   ;;  %s38_s21 = sshll.u32 %s1969_s1, 4  ;;  %s1625_s21 = int_to_ptr.vmem [resolvable:$true] %s38_s21 }
   0x7   :  { %s59_s18 = sshll.u32 %s1548_s17, 4  ;;  %s1380_s24 = scalar_lea.hbm %s1971_s3, 512  ;;  %s60_s18 = int_to_ptr.vmem [resolvable:$true] %s59_s18 }
   0x8   :  { %p1381_p0 = scmp.ne.s32.totalorder %s1971_s3, %s1380_s24  ;;  %p1384_p1 = scmp.lt.u32.totalorder %s1380_s24, %s1971_s3 }
   0xa   :  { %p1386_p2 = pnand %p1384_p1, %p1381_p0 }
   0xc   :  { %1389 = shalt.err (!%p1386_p2)
}
   0xd   :  { %s1390_s29 = scalar_lea.vmem %s60_s18, 512  ;;  %p1395_p4 = scmp.lt.s32.totalorder %s60_s18, %s60_s18 }
   0xe   :  { %p1391_p3 = scmp.ne.s32.totalorder %s60_s18, %s1390_s29  ;;  %p1396_p5 = scmp.lt.s32.totalorder %s1390_s29, %s1390_s29 }
  0x10   :  { %p1397_p6 = por %p1396_p5, %p1395_p4 }
  0x12   :  { %p1398_p7 = pnand %p1397_p6, %p1391_p3 }
  0x14   :  { %1401 = shalt.err (!%p1398_p7)
}
  0x15   :  { %s1549_s1 = smov 128   ;;  %s1550_s30 = smov 8  }
  0x16   :  { %65 = dma.hbm_to_vmem [thread:$0]  %s1971_s3, 512, %s60_s18, [#allocation10], %s1549_s1, %s1549_s1, %s1550_s30  }
  0x17   :  { %s1402_s16 = scalar_lea.hbm %s1968_s0, 16 }
  0x18   :  { %p1403_p8 = scmp.ne.s32.totalorder %s1968_s0, %s1402_s16  ;;  %p1406_p9 = scmp.lt.u32.totalorder %s1402_s16, %s1968_s0 }
  0x1a   :  { %p1408_p10 = pnand %p1406_p9, %p1403_p8 }
  0x1c   :  { %1411 = shalt.err (!%p1408_p10)
}
  0x1d   :  { %s1551_s23 = smov [#allocation2]   ;;  %s1412_s3 = scalar_lea.vmem %s1625_s21, 16 }
  0x1e   :  { %31 = dma.hbm_to_smem %s1968_s0, 16, %s1551_s23, [#allocation5]  }
  0x1f   :  { %p1413_p11 = scmp.ne.s32.totalorder %s1625_s21, %s1412_s3  ;;  %p1417_p12 = scmp.lt.s32.totalorder %s1625_s21, %s1625_s21 }
  0x20   :  { %p1418_p13 = scmp.lt.s32.totalorder %s1412_s3, %s1412_s3 }
  0x22   :  { %p1419_p0 = por %p1418_p13, %p1417_p12 }
  0x24   :  { %p1420_p1 = pnand %p1419_p0, %p1413_p11 }
  0x26   :  { %1423 = shalt.err (!%p1420_p1)
}
  0x27   :  { %s1552_s18 = smov [#allocation7]   ;;  %s1553_s26 = smov [#allocation8]  }
  0x28   :  { %41 = dma.vmem_to_smem %s1625_s21, 16, %s1552_s18, [#allocation6]  }
  0x29   :  { %s47_s27 = sshll.u32 %s1553_s26, 4  ;;  %s1554_s28 = smov [#allocation11]   ;;  %s48_s27 = int_to_ptr.vmem [resolvable:$true] %s47_s27 }
  0x2a   :  { %s71_s29 = sshll.u32 %s1554_s28, 4  ;;  %s1424_s0 = scalar_lea.hbm %s1970_s2, 256  ;;  %s72_s29 = int_to_ptr.vmem [resolvable:$true] %s71_s29 }
  0x2b   :  { %p1425_p2 = scmp.ne.s32.totalorder %s1970_s2, %s1424_s0  ;;  %p1428_p3 = scmp.lt.u32.totalorder %s1424_s0, %s1970_s2 }
  0x2d   :  { %p1430_p4 = pnand %p1428_p3, %p1425_p2 }
  0x2f   :  { %1433 = shalt.err (!%p1430_p4)
}
  0x30   :  { %s1434_s21 = scalar_lea.vmem %s48_s27, 256  ;;  %p1439_p6 = scmp.lt.s32.totalorder %s48_s27, %s48_s27 }
  0x31   :  { %p1435_p5 = scmp.ne.s32.totalorder %s48_s27, %s1434_s21  ;;  %p1440_p7 = scmp.lt.s32.totalorder %s1434_s21, %s1434_s21 }
  0x33   :  { %p1441_p8 = por %p1440_p7, %p1439_p6 }
  0x35   :  { %p1442_p9 = pnand %p1441_p8, %p1435_p5 }
  0x37   :  { %1445 = shalt.err (!%p1442_p9)
}
  0x38   :  { %53 = dma.hbm_to_vmem [thread:$0]  %s1970_s2, 256, %s48_s27, [#allocation3], %s1549_s1, %s1549_s1, %s1550_s30  }
  0x39   :  { %s1446_s24 = scalar_lea.hbm %s1972_s4, 512 }
  0x3a   :  { %p1447_p10 = scmp.ne.s32.totalorder %s1972_s4, %s1446_s24  ;;  %p1450_p11 = scmp.lt.u32.totalorder %s1446_s24, %s1972_s4 }
  0x3c   :  { %p1452_p12 = pnand %p1450_p11, %p1447_p10 }
  0x3e   :  { %1455 = shalt.err (!%p1452_p12)
}
  0x3f   :  { %s1456_s28 = scalar_lea.vmem %s72_s29, 512  ;;  %p1461_p0 = scmp.lt.s32.totalorder %s72_s29, %s72_s29 }
  0x40   :  { %p1457_p13 = scmp.ne.s32.totalorder %s72_s29, %s1456_s28  ;;  %p1462_p1 = scmp.lt.s32.totalorder %s1456_s28, %s1456_s28 }
  0x42   :  { %p1463_p2 = por %p1462_p1, %p1461_p0 }
  0x44   :  { %p1464_p3 = pnand %p1463_p2, %p1457_p13 }
  0x46   :  { %1467 = shalt.err (!%p1464_p3)
}
  0x47   :  { %77 = dma.hbm_to_vmem [thread:$0]  %s1972_s4, 512, %s72_s29, [#allocation10], %s1549_s1, %s1549_s1, %s1550_s30  }
  0x48   :  { %s1555_s12 = smov [#allocation12]   ;;  %s1468_s15 = scalar_lea.hbm %s1975_s7, 512 }
  0x49   :  { %s87_s13 = sshll.u32 %s1555_s12, 4  ;;  %p1469_p4 = scmp.ne.s32.totalorder %s1975_s7, %s1468_s15  ;;  %s88_s13 = int_to_ptr.vmem [resolvable:$true] %s87_s13 }
  0x4a   :  { %p1472_p5 = scmp.lt.u32.totalorder %s1468_s15, %s1975_s7 }
  0x4c   :  { %p1474_p6 = pnand %p1472_p5, %p1469_p4 }
  0x4e   :  { %1477 = shalt.err (!%p1474_p6)
}
  0x4f   :  { %s1478_s20 = scalar_lea.vmem %s88_s13, 512  ;;  %p1483_p8 = scmp.lt.s32.totalorder %s88_s13, %s88_s13 }
  0x50   :  { %p1479_p7 = scmp.ne.s32.totalorder %s88_s13, %s1478_s20  ;;  %p1484_p9 = scmp.lt.s32.totalorder %s1478_s20, %s1478_s20 }
  0x52   :  { %p1485_p10 = por %p1484_p9, %p1483_p8 }
  0x54   :  { %p1486_p11 = pnand %p1485_p10, %p1479_p7 }
  0x56   :  { %1489 = shalt.err (!%p1486_p11)
}
  0x57   :  { %93 = dma.hbm_to_vmem [thread:$0]  %s1975_s7, 512, %s88_s13, [#allocation13], %s1549_s1, %s1549_s1, %s1550_s30  }
  0x58   :  { %1534 = dma.done.wait [#allocation5], 16  }
  0x59   :  { %1535 = vsyncadd [#allocation5], 4294967280 }
  0x5a   :  { %1536 = dma.done.wait [#allocation6], 16  }
  0x5b   :  { %1537 = vsyncadd [#allocation6], 4294967280 }
  0x5c   :  { %1538 = dma.done.wait [#allocation3], 256  }
  0x5d   :  { %1539 = vsyncadd [#allocation3], 4294967040 }
  0x5e   :  { %1540 = dma.done.wait [#allocation10], 1024  }
  0x5f   :  { %1541 = vsyncadd [#allocation10], 4294966272 }
  0x60   :  { %1542 = dma.done.wait [#allocation13], 512  }
  0x61   :  { %1543 = vsyncadd [#allocation13], 4294966784 }
  0x62   :  { %116 = sfence }
  0x63   :  { %v123_v0 = vld [vmem:[#allocation11] sm:$0xff]  ;;  %v124_v1 = vld [vmem:[#allocation11 + $0x8] sm:$0xff]  ;;  %vm134_vm0 = vcmask 261120   ;;  %v125_v5 = vld [vmem:[#allocation11 + $0x10] sm:$0xff]  ;;  %s1558_s23 = smov 96   ;;  %vm624_vm13 = vcmask 785920  }
  0x64   :  { %v316_v2 = vld [vmem:[#allocation12] sm:$0xff]  ;;  %v1254_v3 = vpack.c.bf16 %v124_v1, %v123_v0  ;;  %v317_v4 = vld [vmem:[#allocation12 + $0x8] sm:$0xff]  ;;  %v126_v6 = vld [vmem:[#allocation11 + $0x18] sm:$0xff]  ;;  %s1212_s26 = sld [smem:[#allocation7 + $0x1]]  ;;  %s1214_s28 = sld [smem:[#allocation7 + $0x3]] }
  0x65   :  { %v1262_v7 = vpack.c.bf16 %v317_v4, %v316_v2  ;;  %v1258_v8 = vpack.c.bf16 %v126_v6, %v125_v5  ;;  %v318_v9 = vld [vmem:[#allocation12 + $0x10] sm:$0xff]  ;;  %v319_v10 = vld [vmem:[#allocation12 + $0x18] sm:$0xff]  ;;  %v119_v13 = vld [vmem:[#allocation9] sm:$0xff]  ;;  %s717_s2 = sld [smem:[#allocation2]]  ;;  %s1872_s27 = sld [smem:[#allocation2 + $0x2]] }
  0x66   :  { %v117_v11 = vld [vmem:[#allocation8] sm:$0xff]  ;;  %1255 = vmatprep.subr.bf16.mxu0 %v1254_v3  ;;  %v1266_v12 = vpack.c.bf16 %v319_v10, %v318_v9  ;;  %1248 = vmatprep.mubr.msk.f32.mxu1 %vm134_vm0, %v119_v13  ;;  %v118_v14 = vld [vmem:[#allocation8 + $0x8] sm:$0xff]  ;;  %v120_v15 = vld [vmem:[#allocation9 + $0x8] sm:$0xff]  ;;  %s1874_s12 = sld [smem:[#allocation2 + $0x3]]  ;;  %s1208_s13 = sld [smem:[#allocation2 + $0x1]] }
  0x67   :  { %1237 = vmatprep.mubr.msk.f32.mxu0 %vm134_vm0, %v117_v11  ;;  %1263 = vmatprep.subr.bf16.mxu1 %v1262_v7  ;;  %v121_v16 = vld [vmem:[#allocation9 + $0x10] sm:$0xff]  ;;  %v122_v17 = vld [vmem:[#allocation9 + $0x18] sm:$0xff]  ;;  %s1560_s0 = smov [#allocation14]  }
  0x68   :  { %1257 = vmatpush3.bf16.msra.mxu0 %v1254_v3  ;;  %1265 = vmatpush3.bf16.msra.mxu1 %v1262_v7  ;;  %v1199_v18 = vld [vmem:[%s1973_s5] ss:$0 sm:$0xff]  ;;  %s1556_s5 = smov 64   ;;  %s1172_s14 = sshll.u32 %s1560_s0, 4  ;;  %s1173_s14 = int_to_ptr.vmem [resolvable:$true] %s1172_s14 }
  0x69   :  { %1259 = vmatprep.subr.bf16.mxu0 %v1258_v8  ;;  %1267 = vmatprep.subr.bf16.mxu1 %v1266_v12  ;;  %v1202_v19 = vld [vmem:[%s1976_s8] ss:$0 sm:$0xff]  ;;  %s1557_s8 = smov 32   ;;  %s1490_s15 = scalar_lea.vmem %s1173_s14, 32 }
  0x6a   :  { %p1491_p12 = scmp.ne.s32.totalorder %s1173_s14, %s1490_s15  ;;  %p1495_p13 = scmp.lt.s32.totalorder %s1173_s14, %s1173_s14 }
  0x6b   :  { %p1496_p0 = scmp.lt.s32.totalorder %s1490_s15, %s1490_s15 }
  0x6c   :  { %1261 = vmatpush3.bf16.msra.mxu0 %v1258_v8  ;;  %1269 = vmatpush3.bf16.msra.mxu1 %v1266_v12 }
  0x6d   :  { %p1497_p1 = por %p1496_p0, %p1495_p13 }
  0x6f   :  { %1238 = vmatmul.mubr.msk.f32.vlgmr.msra.gmra.mrb[0].mxu0 %vm134_vm0, %v118_v14  ;;  %1249 = vmatmul.mubr.msk.f32.vlgmr.msra.gmra.mrb[0].mxu1 %vm134_vm0, %v120_v15  ;;  %p1498_p2 = pnand %p1497_p1, %p1491_p12 }
  0x70   :  { %1251 = vmatprep.mubr.msk.f32.mxu1 %vm134_vm0, %v121_v16 }
  0x73   :  { %1252 = vmatmul.mubr.msk.f32.gmra.mrb[2].mxu1 %vm134_vm0, %v122_v17 }
 0x142   :  { %v1239_v20 = vpop.f32.mrb[0].mxu0  ;;  %v1250_v22 = vpop.f32.mrb[0].mxu1 }
 0x143   :  { %v1716_v21 = vadd.f32 %v1239_v20, %v1199_v18  ;;  %v207_v23 = vpop.f32.mrb[1].mxu0  ;;  %v1718_v24 = vadd.f32 %v1250_v22, %v1202_v19  ;;  %v405_v25 = vpop.f32.mrb[1].mxu1 }
 0x144   :  { %v1722_v27 = vadd.f32 %v1202_v19, %v405_v25  ;;  %v1728_v31 = vadd.f32 %v1199_v18, %v207_v23 }
 0x145   :  { %v217_v26 = vmul.f32 %v1716_v21, %v1716_v21  ;;  %v425_v28 = vmul.f32 %v1718_v24, %v1718_v24 }
 0x146   :  { %v1253_v29 = vpop.f32.mrb[2].mxu1  ;;  %v424_v34 = vmul.f32 %v1722_v27, %v1722_v27  ;;  %v216_v37 = vmul.f32 %v1728_v31, %v1728_v31 }
 0x147   :  { %254 = vrot.lane.b32.xlu1 %v217_v26, %s1556_s5  ;;  %v1726_v30 = vadd.f32 %v1253_v29, %v1202_v19  ;;  %498 = vrot.lane.b32.xlu0 %v425_v28, %s1556_s5  ;;  %v415_v32 = vpop.f32.mrb[3].mxu1 }
 0x148   :  { %v1730_v33 = vadd.f32 %v1202_v19, %v415_v32 }
 0x149   :  { %v427_v35 = vmul.f32 %v1726_v30, %v1726_v30 }
 0x14a   :  { %v426_v36 = vmul.f32 %v1730_v33, %v1730_v33 }
 0x14b   :  { %496 = vrot.lane.b32.xlu0 %v424_v34, %s1556_s5  ;;  %502 = vrot.lane.b32.xlu1 %v427_v35, %s1556_s5 }
 0x14f   :  { %500 = vrot.lane.b32.xlu1 %v426_v36, %s1556_s5  ;;  %252 = vrot.lane.b32.xlu0 %v216_v37, %s1556_s5 }
 0x153   :  { %284 = vrot.lane.b32.xlu1 %v216_v37, %s1557_s8  ;;  %286 = vrot.lane.b32.xlu0 %v217_v26, %s1557_s8 }
 0x157   :  { %560 = vrot.lane.b32.xlu1 %v424_v34, %s1557_s8  ;;  %432 = vrot.lane.b32.xlu0 %v424_v34, %s1558_s23 }
 0x15b   :  { %562 = vrot.lane.b32.xlu1 %v425_v28, %s1557_s8  ;;  %564 = vrot.lane.b32.xlu0 %v426_v36, %s1557_s8 }
 0x15f   :  { %566 = vrot.lane.b32.xlu1 %v427_v35, %s1557_s8  ;;  %436 = vrot.lane.b32.xlu0 %v426_v36, %s1558_s23 }
 0x163   :  { %434 = vrot.lane.b32.xlu1 %v425_v28, %s1558_s23 }
 0x167   :  { %438 = vrot.lane.b32.xlu1 %v427_v35, %s1558_s23 }
 0x1b9   :  { %v499_v38 = vpop.permute.xlu0 %498  ;;  %v255_v40 = vpop.permute.xlu1 %254 }
 0x1ba   :  { %v511_v39 = vsel %vm134_vm0, %v499_v38, 0.0  ;;  %v261_v41 = vsel %vm134_vm0, %v255_v40, 0.0 }
 0x1bb   :  { %512 = vadd.xlane.f32.xlu1 %v511_v39 }
 0x1bd   :  { %v497_v42 = vpop.permute.xlu0 %496  ;;  %v503_v46 = vpop.permute.xlu1 %502 }
 0x1be   :  { %v508_v43 = vsel %vm134_vm0, %v497_v42, 0.0  ;;  %v517_v47 = vsel %vm134_vm0, %v503_v46, 0.0 }
 0x1bf   :  { %262 = vadd.xlane.f32.xlu1 %v261_v41  ;;  %509 = vadd.xlane.f32.xlu0 %v508_v43 }
 0x1c1   :  { %v253_v44 = vpop.permute.xlu0 %252  ;;  %v501_v48 = vpop.permute.xlu1 %500 }
 0x1c2   :  { %v258_v45 = vsel %vm134_vm0, %v253_v44, 0.0  ;;  %v514_v49 = vsel %vm134_vm0, %v501_v48, 0.0 }
 0x1c3   :  { %259 = vadd.xlane.f32.xlu0 %v258_v45 }
 0x1c5   :  { %v287_v50 = vpop.permute.xlu0 %286  ;;  %v285_v52 = vpop.permute.xlu1 %284 }
 0x1c6   :  { %v293_v53 = vsel %vm134_vm0, %v287_v50, 0.0  ;;  %v290_v60 = vsel %vm134_vm0, %v285_v52, 0.0 }
 0x1c7   :  { %518 = vadd.xlane.f32.xlu0 %v517_v47 }
 0x1c9   :  { %v433_v51 = vpop.permute.xlu0 %432  ;;  %v561_v56 = vpop.permute.xlu1 %560 }
 0x1ca   :  { %v444_v57 = vsel %vm134_vm0, %v433_v51, 0.0  ;;  %v572_v62 = vsel %vm134_vm0, %v561_v56, 0.0 }
 0x1cb   :  { %515 = vadd.xlane.f32.xlu0 %v514_v49 }
 0x1cd   :  { %v565_v54 = vpop.permute.xlu0 %564  ;;  %v563_v59 = vpop.permute.xlu1 %562 }
 0x1ce   :  { %v578_v55 = vsel %vm134_vm0, %v565_v54, 0.0  ;;  %v575_v0 = vsel %vm134_vm0, %v563_v59, 0.0 }
 0x1d0   :  { %222 = vrot.lane.b32.xlu1 %v217_v26, %s1558_s23 }
 0x1d1   :  { %v437_v58 = vpop.permute.xlu0 %436  ;;  %v567_v63 = vpop.permute.xlu1 %566 }
 0x1d2   :  { %v450_v61 = vsel %vm134_vm0, %v437_v58, 0.0  ;;  %v581_v2 = vsel %vm134_vm0, %v567_v63, 0.0 }
 0x1d5   :  { %v435_v1 = vpop.permute.xlu1 %434 }
 0x1d6   :  { %v447_v3 = vsel %vm134_vm0, %v435_v1, 0.0 }
 0x1d9   :  { %v439_v4 = vpop.permute.xlu1 %438 }
 0x1da   :  { %v453_v5 = vsel %vm134_vm0, %v439_v4, 0.0 }
 0x1e1   :  { %220 = vrot.lane.b32.xlu0 %v216_v37, %s1558_s23 }
 0x1f4   :  { %294 = vadd.xlane.f32.xlu1 %v293_v53 }
 0x1f8   :  { %579 = vadd.xlane.f32.xlu1 %v578_v55 }
 0x1fc   :  { %445 = vadd.xlane.f32.xlu1 %v444_v57 }
 0x200   :  { %291 = vadd.xlane.f32.xlu0 %v290_v60  ;;  %451 = vadd.xlane.f32.xlu1 %v450_v61 }
 0x204   :  { %573 = vadd.xlane.f32.xlu0 %v572_v62 }
 0x208   :  { %576 = vadd.xlane.f32.xlu0 %v575_v0 }
 0x20c   :  { %582 = vadd.xlane.f32.xlu0 %v581_v2 }
 0x210   :  { %448 = vadd.xlane.f32.xlu0 %v447_v3 }
 0x214   :  { %454 = vadd.xlane.f32.xlu0 %v453_v5 }
 0x248   :  { %v513_v6 = vpop.xlane.xlu1 %512 }
 0x249   :  { %1286 = vrsqrt.f32 %v513_v6  ;;  %vm529_vm1 = vcmp.eq.f32.partialorder %v513_v6, inf  ;;  %v532_v15 = vand.u32 2147483648, %v513_v6  ;;  %vm531_vm2 = vcmp.eq.f32.partialorder %v513_v6, 0.0 }
 0x24c   :  { %v263_v7 = vpop.xlane.xlu1 %262  ;;  %v510_v8 = vpop.xlane.xlu0 %509 }
 0x24d   :  { %1288 = vrsqrt.f32 %v263_v7  ;;  %vm273_vm3 = vcmp.eq.f32.partialorder %v263_v7, inf  ;;  %v276_v25 = vand.u32 2147483648, %v263_v7  ;;  %vm275_vm4 = vcmp.eq.f32.partialorder %v263_v7, 0.0 }
 0x24e   :  { %1290 = vrsqrt.f32 %v510_v8  ;;  %vm522_vm5 = vcmp.eq.f32.partialorder %v510_v8, inf  ;;  %v525_v29 = vand.u32 2147483648, %v510_v8  ;;  %vm524_vm6 = vcmp.eq.f32.partialorder %v510_v8, 0.0 }
 0x250   :  { %v223_v9 = vpop.permute.xlu1 %222  ;;  %v260_v10 = vpop.xlane.xlu0 %259 }
 0x251   :  { %1292 = vrsqrt.f32 %v260_v10  ;;  %v229_v11 = vsel %vm134_vm0, %v223_v9, 0.0  ;;  %vm266_vm7 = vcmp.eq.f32.partialorder %v260_v10, inf  ;;  %v269_v41 = vand.u32 2147483648, %v260_v10 }
 0x252   :  { %230 = vadd.xlane.f32.xlu0 %v229_v11  ;;  %vm268_vm8 = vcmp.eq.f32.partialorder %v260_v10, 0.0 }
 0x253   :  { %v1287_v12 = vpop.eup %1286 }
 0x254   :  { %v528_v13 = vmul.f32 %v1287_v12, %v513_v6  ;;  %v519_v14 = vpop.xlane.xlu0 %518 }
 0x255   :  { %1294 = vrsqrt.f32 %v519_v14  ;;  %vm543_vm9 = vcmp.eq.f32.partialorder %v519_v14, inf  ;;  %v546_v48 = vand.u32 2147483648, %v519_v14  ;;  %vm545_vm10 = vcmp.eq.f32.partialorder %v519_v14, 0.0 }
 0x256   :  { %v530_v16 = vsel %vm529_vm1, %v513_v6, %v528_v13 }
 0x257   :  { %v1289_v17 = vpop.eup %1288  ;;  %v533_v18 = vsel %vm531_vm2, %v532_v15, %v530_v16 }
 0x258   :  { %v1291_v19 = vpop.eup %1290  ;;  %v549_v20 = vmax.f32 %v533_v18, 1e-12  ;;  %v272_v22 = vmul.f32 %v1289_v17, %v263_v7  ;;  %v516_v23 = vpop.xlane.xlu0 %515 }
 0x259   :  { %v521_v26 = vmul.f32 %v1291_v19, %v510_v8  ;;  %1296 = vrsqrt.f32 %v516_v23  ;;  %vm536_vm11 = vcmp.eq.f32.partialorder %v516_v23, inf  ;;  %v539_v55 = vand.u32 2147483648, %v516_v23 }
 0x25a   :  { %v274_v28 = vsel %vm273_vm3, %v263_v7, %v272_v22  ;;  %1298 = vrcp.f32 %v549_v20  ;;  %vm538_vm12 = vcmp.eq.f32.partialorder %v516_v23, 0.0 }
 0x25b   :  { %v1293_v32 = vpop.eup %1292  ;;  %v277_v34 = vsel %vm275_vm4, %v276_v25, %v274_v28  ;;  %v523_v35 = vsel %vm522_vm5, %v510_v8, %v521_v26  ;;  %vm663_vm4 = vcmask 1048320  }
 0x25c   :  { %v279_v36 = vmax.f32 %v277_v34, 1e-12  ;;  %v526_v37 = vsel %vm524_vm6, %v525_v29, %v523_v35  ;;  %v265_v38 = vmul.f32 %v1293_v32, %v260_v10  ;;  %v221_v39 = vpop.permute.xlu0 %220 }
 0x25d   :  { %v548_v40 = vmax.f32 %v526_v37, 1e-12  ;;  %v226_v42 = vsel %vm134_vm0, %v221_v39, 0.0 }
 0x25e   :  { %1300 = vrcp.f32 %v279_v36  ;;  %v267_v43 = vsel %vm266_vm7, %v260_v10, %v265_v38  ;;  %227 = vadd.xlane.f32.xlu1 %v226_v42 }
 0x25f   :  { %v1295_v44 = vpop.eup %1294  ;;  %1302 = vrcp.f32 %v548_v40  ;;  %v270_v45 = vsel %vm268_vm8, %v269_v41, %v267_v43 }
 0x260   :  { %v278_v46 = vmax.f32 %v270_v45, 1e-12  ;;  %v542_v47 = vmul.f32 %v1295_v44, %v519_v14 }
 0x262   :  { %1304 = vrcp.f32 %v278_v46  ;;  %v544_v49 = vsel %vm543_vm9, %v519_v14, %v542_v47 }
 0x263   :  { %v1297_v50 = vpop.eup %1296  ;;  %v547_v51 = vsel %vm545_vm10, %v546_v48, %v544_v49 }
 0x264   :  { %v551_v52 = vmax.f32 %v547_v51, 1e-12  ;;  %v535_v53 = vmul.f32 %v1297_v50, %v516_v23  ;;  %v1299_v54 = vpop.eup %1298 }
 0x265   :  { %v557_v60 = vmul.f32 %v1299_v54, %v1718_v24 }
 0x266   :  { %1306 = vrcp.f32 %v551_v52  ;;  %v537_v56 = vsel %vm536_vm11, %v516_v23, %v535_v53 }
 0x267   :  { %v540_v57 = vsel %vm538_vm12, %v539_v55, %v537_v56  ;;  %v643_v3 = vsel %vm624_vm13, %v557_v60, 0.0 }
 0x268   :  { %v1301_v58 = vpop.eup %1300  ;;  %v550_v59 = vmax.f32 %v540_v57, 1e-12 }
 0x269   :  { %v1303_v61 = vpop.eup %1302  ;;  %v283_v62 = vmul.f32 %v1301_v58, %v1716_v21 }
 0x26a   :  { %1308 = vrcp.f32 %v550_v59  ;;  %v556_v63 = vmul.f32 %v1303_v61, %v1722_v27 }
 0x26b   :  { %v632_v0 = vsel %vm624_vm13, %v283_v62, 0.0 }
 0x26c   :  { %v1305_v1 = vpop.eup %1304  ;;  %v642_v2 = vsel %vm624_vm13, %v556_v63, 0.0  ;;  %v633_v4 = vrot.slane %v632_v0, 4 }
 0x26d   :  { %v644_v5 = vadd.f32 %v643_v3, %v642_v2  ;;  %v282_v6 = vmul.f32 %v1305_v1, %v1728_v31 }
 0x26e   :  { %v634_v9 = vadd.f32 %v633_v4, %v632_v0 }
 0x26f   :  { %v645_v7 = vrot.slane %v644_v5, 4  ;;  %v625_v8 = vsel %vm624_vm13, %v282_v6, 0.0 }
 0x270   :  { %v1307_v10 = vpop.eup %1306  ;;  %v626_v11 = vrot.slane %v625_v8, 4  ;;  %v635_v15 = vrot.slane %v634_v9, 2 }
 0x271   :  { %v646_v12 = vadd.f32 %v645_v7, %v644_v5  ;;  %v559_v16 = vmul.f32 %v1307_v10, %v1726_v30 }
 0x272   :  { %v627_v13 = vadd.f32 %v626_v11, %v625_v8  ;;  %v636_v25 = vadd.f32 %v635_v15, %v634_v9 }
 0x273   :  { %v647_v14 = vrot.slane %v646_v12, 2  ;;  %v652_v28 = vsel %vm624_vm13, %v559_v16, 0.0 }
 0x274   :  { %v1309_v17 = vpop.eup %1308  ;;  %v628_v18 = vrot.slane %v627_v13, 2  ;;  %v637_v38 = vrot.slane %v636_v25, 1 }
 0x275   :  { %v648_v19 = vadd.f32 %v647_v14, %v646_v12  ;;  %v558_v20 = vmul.f32 %v1309_v17, %v1730_v33 }
 0x276   :  { %v629_v22 = vadd.f32 %v628_v18, %v627_v13  ;;  %v638_v42 = vadd.f32 %v637_v38, %v636_v25 }
 0x277   :  { %v649_v23 = vrot.slane %v648_v19, 1  ;;  %v651_v26 = vsel %vm624_vm13, %v558_v20, 0.0 }
 0x278   :  { %v630_v29 = vrot.slane %v629_v22, 1  ;;  %v653_v32 = vadd.f32 %v652_v28, %v651_v26  ;;  %v641_v45 = vmul.f32 0.125, %v638_v42 }
 0x279   :  { %v650_v34 = vadd.f32 %v649_v23, %v648_v19 }
 0x27a   :  { %v654_v35 = vrot.slane %v653_v32, 4  ;;  %v631_v37 = vadd.f32 %v630_v29, %v629_v22 }
 0x27b   :  { %v661_v36 = vmul.f32 0.0625, %v650_v34 }
 0x27c   :  { %v655_v39 = vadd.f32 %v654_v35, %v653_v32  ;;  %v640_v41 = vmul.f32 0.125, %v631_v37 }
 0x27d   :  { %915 = vrot.lane.b32.xlu1 %v661_v36, %s1558_s23 }
 0x27e   :  { %v656_v40 = vrot.slane %v655_v39, 2 }
 0x280   :  { %v657_v43 = vadd.f32 %v656_v40, %v655_v39 }
 0x281   :  { %723 = vrot.lane.b32.xlu1 %v640_v41, %s1558_s23  ;;  %v295_v44 = vpop.xlane.xlu1 %294 }
 0x282   :  { %1310 = vrsqrt.f32 %v295_v44  ;;  %v658_v46 = vrot.slane %v657_v43, 1  ;;  %vm305_vm14 = vcmp.eq.f32.partialorder %v295_v44, inf  ;;  %v308_v53 = vand.u32 2147483648, %v295_v44 }
 0x283   :  { %vm307_vm15 = vcmp.eq.f32.partialorder %v295_v44, 0.0 }
 0x284   :  { %v659_v47 = vadd.f32 %v658_v46, %v657_v43 }
 0x285   :  { %725 = vrot.lane.b32.xlu1 %v641_v45, %s1558_s23  ;;  %v580_v49 = vpop.xlane.xlu1 %579 }
 0x286   :  { %v662_v48 = vmul.f32 0.0625, %v659_v47  ;;  %1312 = vrsqrt.f32 %v580_v49  ;;  %vm600_vm1 = vcmp.eq.f32.partialorder %v580_v49, inf  ;;  %v603_v5 = vand.u32 2147483648, %v580_v49 }
 0x287   :  { %vm602_vm5 = vcmp.eq.f32.partialorder %v580_v49, 0.0 }
 0x288   :  { %917 = vrot.lane.b32.xlu0 %v662_v48, %s1558_s23 }
 0x28c   :  { %v1311_v50 = vpop.eup %1310 }
 0x28d   :  { %v304_v51 = vmul.f32 %v1311_v50, %v295_v44  ;;  %v292_v52 = vpop.xlane.xlu0 %291 }
 0x28e   :  { %1314 = vrsqrt.f32 %v292_v52  ;;  %vm298_vm2 = vcmp.eq.f32.partialorder %v292_v52, inf  ;;  %v301_v0 = vand.u32 2147483648, %v292_v52  ;;  %vm300_vm3 = vcmp.eq.f32.partialorder %v292_v52, 0.0 }
 0x28f   :  { %v306_v54 = vsel %vm305_vm14, %v295_v44, %v304_v51 }
 0x290   :  { %v309_v55 = vsel %vm307_vm15, %v308_v53, %v306_v54  ;;  %v1313_v58 = vpop.eup %1312 }
 0x291   :  { %v311_v56 = vmax.f32 %v309_v55, 1e-12  ;;  %v574_v57 = vpop.xlane.xlu0 %573  ;;  %v599_v60 = vmul.f32 %v1313_v58, %v580_v49 }
 0x292   :  { %1316 = vrsqrt.f32 %v574_v57  ;;  %vm586_vm6 = vcmp.eq.f32.partialorder %v574_v57, inf  ;;  %v589_v9 = vand.u32 2147483648, %v574_v57  ;;  %vm588_vm7 = vcmp.eq.f32.partialorder %v574_v57, 0.0 }
 0x293   :  { %1318 = vrcp.f32 %v311_v56  ;;  %v601_v2 = vsel %vm600_vm1, %v580_v49, %v599_v60 }
 0x294   :  { %v604_v10 = vsel %vm602_vm5, %v603_v5, %v601_v2 }
 0x295   :  { %v577_v59 = vpop.xlane.xlu0 %576  ;;  %v614_v18 = vmax.f32 %v604_v10, 1e-12 }
 0x296   :  { %1320 = vrsqrt.f32 %v577_v59  ;;  %vm593_vm8 = vcmp.eq.f32.partialorder %v577_v59, inf  ;;  %v596_v19 = vand.u32 2147483648, %v577_v59  ;;  %vm595_vm9 = vcmp.eq.f32.partialorder %v577_v59, 0.0 }
 0x298   :  { %v1315_v61 = vpop.eup %1314 }
 0x299   :  { %v583_v62 = vpop.xlane.xlu0 %582  ;;  %v297_v63 = vmul.f32 %v1315_v61, %v292_v52 }
 0x29a   :  { %1322 = vrsqrt.f32 %v583_v62  ;;  %vm607_vm10 = vcmp.eq.f32.partialorder %v583_v62, inf  ;;  %v610_v29 = vand.u32 2147483648, %v583_v62  ;;  %vm609_vm11 = vcmp.eq.f32.partialorder %v583_v62, 0.0 }
 0x29b   :  { %v299_v3 = vsel %vm298_vm2, %v292_v52, %v297_v63 }
 0x29c   :  { %v1317_v1 = vpop.eup %1316  ;;  %v302_v6 = vsel %vm300_vm3, %v301_v0, %v299_v3 }
 0x29d   :  { %v1319_v4 = vpop.eup %1318  ;;  %v585_v7 = vmul.f32 %v1317_v1, %v574_v57  ;;  %v310_v8 = vmax.f32 %v302_v6, 1e-12 }
 0x29e   :  { %v1787_v12 = vmul.f32 %v1319_v4, %v1716_v21 }
 0x29f   :  { %v587_v11 = vsel %vm586_vm6, %v574_v57, %v585_v7  ;;  %1324 = vrcp.f32 %v310_v8 }
 0x2a0   :  { %v1321_v13 = vpop.eup %1320  ;;  %v590_v14 = vsel %vm588_vm7, %v589_v9, %v587_v11  ;;  %v671_v17 = vsel %vm663_vm4, %v1787_v12, 0.0 }
 0x2a1   :  { %v612_v15 = vmax.f32 %v590_v14, 1e-12  ;;  %v592_v16 = vmul.f32 %v1321_v13, %v577_v59  ;;  %v672_v25 = vrot.slane %v671_v17, 4 }
 0x2a3   :  { %1326 = vrcp.f32 %v612_v15  ;;  %v594_v20 = vsel %vm593_vm8, %v577_v59, %v592_v16  ;;  %v673_v35 = vadd.f32 %v672_v25, %v671_v17  ;;  %v446_v15 = vpop.xlane.xlu1 %445 }
 0x2a4   :  { %v1323_v22 = vpop.eup %1322  ;;  %v597_v23 = vsel %vm595_vm9, %v596_v19, %v594_v20  ;;  %1328 = vrcp.f32 %v614_v18  ;;  %v449_v18 = vpop.xlane.xlu0 %448  ;;  %vm458_vm12 = vcmp.eq.f32.partialorder %v446_v15, inf  ;;  %vm460_vm14 = vcmp.eq.f32.partialorder %v446_v15, 0.0 }
 0x2a5   :  { %v613_v26 = vmax.f32 %v597_v23, 1e-12  ;;  %v606_v28 = vmul.f32 %v1323_v22, %v583_v62  ;;  %v674_v39 = vrot.slane %v673_v35, 2  ;;  %vm465_vm13 = vcmp.eq.f32.partialorder %v449_v18, inf }
 0x2a6   :  { %vm467_vm15 = vcmp.eq.f32.partialorder %v449_v18, 0.0  ;;  %vm1024_vm9 = vcmask 130112  }
 0x2a7   :  { %1330 = vrcp.f32 %v613_v26  ;;  %v608_v32 = vsel %vm607_vm10, %v583_v62, %v606_v28  ;;  %v675_v47 = vadd.f32 %v674_v39, %v673_v35  ;;  %v452_v28 = vpop.xlane.xlu1 %451  ;;  %v461_v39 = vand.u32 2147483648, %v446_v15 }
 0x2a8   :  { %v611_v34 = vsel %vm609_vm11, %v610_v29, %v608_v32  ;;  %vm472_vm1 = vcmp.eq.f32.partialorder %v452_v28, inf  ;;  %vm474_vm3 = vcmp.eq.f32.partialorder %v452_v28, 0.0  ;;  %vm789_vm10 = vcmask 1041409  }
 0x2a9   :  { %v615_v36 = vmax.f32 %v611_v34, 1e-12  ;;  %v1325_v37 = vpop.eup %1324  ;;  %v676_v54 = vrot.slane %v675_v47, 1  ;;  %v455_v34 = vpop.xlane.xlu0 %454  ;;  %vm1037_vm11 = vcmask 123904  }
 0x2aa   :  { %v314_v38 = vmul.f32 %v1325_v37, %v1728_v31  ;;  %vm479_vm2 = vcmp.eq.f32.partialorder %v455_v34, inf }
 0x2ab   :  { %1332 = vrcp.f32 %v615_v36  ;;  %v677_v61 = vadd.f32 %v676_v54, %v675_v47 }
 0x2ac   :  { %v664_v41 = vsel %vm663_vm4, %v314_v38, 0.0  ;;  %1334 = vrsqrt.f32 %v446_v15 }
 0x2ad   :  { %v1327_v40 = vpop.eup %1326  ;;  %v665_v43 = vrot.slane %v664_v41, 4  ;;  %v679_v7 = vmul.f32 0.125, %v677_v61  ;;  %1336 = vrsqrt.f32 %v449_v18 }
 0x2ae   :  { %v620_v42 = vmul.f32 %v1327_v40, %v1722_v27  ;;  %v1329_v44 = vpop.eup %1328  ;;  %1338 = vrsqrt.f32 %v452_v28 }
 0x2af   :  { %v666_v45 = vadd.f32 %v665_v43, %v664_v41  ;;  %v622_v53 = vmul.f32 %v1329_v44, %v1730_v33  ;;  %1340 = vrsqrt.f32 %v455_v34 }
 0x2b0   :  { %v680_v46 = vsel %vm663_vm4, %v620_v42, 0.0 }
 0x2b1   :  { %v1331_v48 = vpop.eup %1330  ;;  %v667_v49 = vrot.slane %v666_v45, 2  ;;  %v689_v62 = vsel %vm663_vm4, %v622_v53, 0.0  ;;  %v955_v13 = vmul.f32 %v679_v7, %v622_v53  ;;  %v482_v53 = vand.u32 2147483648, %v455_v34 }
 0x2b2   :  { %v621_v50 = vmul.f32 %v1331_v48, %v1718_v24 }
 0x2b3   :  { %v668_v51 = vadd.f32 %v667_v49, %v666_v45 }
 0x2b4   :  { %v681_v52 = vsel %vm663_vm4, %v621_v50, 0.0 }
 0x2b5   :  { %v1333_v55 = vpop.eup %1332  ;;  %v682_v56 = vadd.f32 %v681_v52, %v680_v46  ;;  %v669_v57 = vrot.slane %v668_v51, 1 }
 0x2b6   :  { %v623_v58 = vmul.f32 %v1333_v55, %v1726_v30  ;;  %v1335_v29 = vpop.eup %1334 }
 0x2b7   :  { %v683_v59 = vrot.slane %v682_v56, 4  ;;  %v670_v60 = vadd.f32 %v669_v57, %v668_v51  ;;  %v1337_v32 = vpop.eup %1336  ;;  %v457_v35 = vmul.f32 %v1335_v29, %v446_v15 }
 0x2b8   :  { %v690_v63 = vsel %vm663_vm4, %v623_v58, 0.0  ;;  %v956_v14 = vmul.f32 %v679_v7, %v623_v58  ;;  %v464_v36 = vmul.f32 %v1337_v32, %v449_v18  ;;  %vm481_vm4 = vcmp.eq.f32.partialorder %v455_v34, 0.0 }
 0x2b9   :  { %v691_v0 = vadd.f32 %v690_v63, %v689_v62  ;;  %v684_v1 = vadd.f32 %v683_v59, %v682_v56  ;;  %v678_v2 = vmul.f32 0.125, %v670_v60  ;;  %v459_v37 = vsel %vm458_vm12, %v446_v15, %v457_v35 }
 0x2ba   :  { %v466_v40 = vsel %vm465_vm13, %v449_v18, %v464_v36  ;;  %v462_v41 = vsel %vm460_vm14, %v461_v39, %v459_v37  ;;  %v882_v37 = vmax.f32 %v1718_v24, 0.0  ;;  %v1211_v39 = vld [vmem:[%s1977_s9] ss:$0 sm:$0xff]  ;;  %s1213_s9 = sld [smem:[#allocation7 + $0x2]]  ;;  %vm792_vm12 = vcmask 58368  }
 0x2bb   :  { %v692_v3 = vrot.slane %v691_v0, 4  ;;  %v685_v4 = vrot.slane %v684_v1, 2  ;;  %v953_v5 = vmul.f32 %v678_v2, %v620_v42  ;;  %v954_v6 = vmul.f32 %v678_v2, %v621_v50 }
 0x2bc   :  { %v484_v43 = vmax.f32 %v462_v41, 1e-12  ;;  %v475_v50 = vand.u32 2147483648, %v452_v28  ;;  %v881_v41 = vmax.f32 %v1722_v27, 0.0  ;;  %vm878_vm13 = vcmask 254976  }
 0x2bd   :  { %v693_v8 = vadd.f32 %v692_v3, %v691_v0  ;;  %v686_v9 = vadd.f32 %v685_v4, %v684_v1  ;;  %961 = vrot.lane.b32.xlu0 %v953_v5, %s1557_s8  ;;  %963 = vrot.lane.b32.xlu1 %v954_v6, %s1557_s8 }
 0x2be   :  { %1342 = vrcp.f32 %v484_v43 }
 0x2bf   :  { %v694_v10 = vrot.slane %v693_v8, 2  ;;  %v687_v11 = vrot.slane %v686_v9, 1 }
 0x2c1   :  { %v695_v16 = vadd.f32 %v694_v10, %v693_v8  ;;  %v688_v17 = vadd.f32 %v687_v11, %v686_v9  ;;  %965 = vrot.lane.b32.xlu0 %v955_v13, %s1557_s8  ;;  %967 = vrot.lane.b32.xlu1 %v956_v14, %s1557_s8 }
 0x2c3   :  { %v696_v19 = vrot.slane %v695_v16, 1  ;;  %v698_v20 = vmul.f32 0.0625, %v688_v17 }
 0x2c5   :  { %v697_v22 = vadd.f32 %v696_v19, %v695_v16  ;;  %v1805_v23 = vmul.f32 %v698_v20, %v314_v38  ;;  %v468_v38 = vand.u32 2147483648, %v449_v18 }
 0x2c7   :  { %v699_v25 = vmul.f32 0.0625, %v697_v22  ;;  %v469_v42 = vsel %vm467_vm15, %v468_v38, %v466_v40  ;;  %v892_v40 = vmul.f32 %v1211_v39, %v882_v37  ;;  %v701_v38 = vmax.f32 %v1728_v31, 0.0 }
 0x2c8   :  { %v485_v45 = vmax.f32 %v469_v42, 1e-12 }
 0x2c9   :  { %v1808_v26 = vmul.f32 %v699_v25, %v1787_v12  ;;  %v1339_v12 = vpop.eup %1338  ;;  %v898_v42 = vsel %vm134_vm0, %v892_v40, 0.0 }
 0x2ca   :  { %v1341_v44 = vpop.eup %1340  ;;  %v471_v46 = vmul.f32 %v1339_v12, %v452_v28  ;;  %1344 = vrcp.f32 %v485_v45 }
 0x2cb   :  { %v478_v47 = vmul.f32 %v1341_v44, %v455_v34  ;;  %v1343_v56 = vpop.eup %1342 }
 0x2cc   :  { %v473_v49 = vsel %vm472_vm1, %v452_v28, %v471_v46  ;;  %v492_v0 = vmul.f32 %v1343_v56, %v1722_v27 }
 0x2cd   :  { %v480_v51 = vsel %vm479_vm2, %v455_v34, %v478_v47  ;;  %v476_v52 = vsel %vm474_vm3, %v475_v50, %v473_v49  ;;  %v702_v49 = vmax.f32 %v1716_v21, 0.0 }
 0x2ce   :  { %v483_v54 = vsel %vm481_vm4, %v482_v53, %v480_v51  ;;  %v486_v55 = vmax.f32 %v476_v52, 1e-12 }
 0x2cf   :  { %v487_v57 = vmax.f32 %v483_v54, 1e-12 }
 0x2d4   :  { %v1345_v58 = vpop.eup %1344 }
 0x2d5   :  { %v493_v1 = vmul.f32 %v1345_v58, %v1718_v24  ;;  %v883_v24 = vmax.f32 %v1730_v33, 0.0 }
 0x2d7   :  { %v893_v45 = vmul.f32 %v1211_v39, %v883_v24 }
 0x2d9   :  { %v901_v27 = vsel %vm134_vm0, %v893_v45, 0.0 }
 0x2df   :  { %v231_v48 = vpop.xlane.xlu0 %230 }
 0x2e0   :  { %1346 = vrsqrt.f32 %v231_v48  ;;  %vm241_vm5 = vcmp.eq.f32.partialorder %v231_v48, inf  ;;  %v244_v62 = vand.u32 2147483648, %v231_v48  ;;  %vm243_vm6 = vcmp.eq.f32.partialorder %v231_v48, 0.0 }
 0x2e1   :  { %1348 = vrcp.f32 %v486_v55 }
 0x2ea   :  { %v1347_v59 = vpop.eup %1346 }
 0x2eb   :  { %v228_v60 = vpop.xlane.xlu1 %227  ;;  %v240_v61 = vmul.f32 %v1347_v59, %v231_v48  ;;  %v1349_v7 = vpop.eup %1348 }
 0x2ec   :  { %1350 = vrsqrt.f32 %v228_v60  ;;  %vm234_vm7 = vcmp.eq.f32.partialorder %v228_v60, inf  ;;  %v237_v11 = vand.u32 2147483648, %v228_v60  ;;  %vm236_vm8 = vcmp.eq.f32.partialorder %v228_v60, 0.0 }
 0x2ed   :  { %1352 = vrcp.f32 %v487_v57  ;;  %v242_v63 = vsel %vm241_vm5, %v231_v48, %v240_v61  ;;  %v494_v16 = vmul.f32 %v1349_v7, %v1730_v33 }
 0x2ee   :  { %v245_v2 = vsel %vm243_vm6, %v244_v62, %v242_v63 }
 0x2ef   :  { %v916_v3 = vpop.permute.xlu1 %915  ;;  %v247_v6 = vmax.f32 %v245_v2, 1e-12 }
 0x2f0   :  { %v921_v4 = vmul.f32 %v916_v3, %v492_v0  ;;  %v922_v5 = vmul.f32 %v916_v3, %v493_v1 }
 0x2f1   :  { %1354 = vrcp.f32 %v247_v6 }
 0x2f2   :  { %929 = vrot.lane.b32.xlu0 %v921_v4, %s1558_s23  ;;  %931 = vrot.lane.b32.xlu1 %v922_v5, %s1558_s23 }
 0x2f3   :  { %v724_v13 = vpop.permute.xlu1 %723 }
 0x2f6   :  { %v1351_v8 = vpop.eup %1350 }
 0x2f7   :  { %v1353_v9 = vpop.eup %1352  ;;  %v233_v10 = vmul.f32 %v1351_v8, %v228_v60  ;;  %v726_v29 = vpop.permute.xlu1 %725 }
 0x2f8   :  { %v495_v17 = vmul.f32 %v1353_v9, %v1726_v30 }
 0x2f9   :  { %v235_v14 = vsel %vm234_vm7, %v228_v60, %v233_v10 }
 0x2fa   :  { %v238_v15 = vsel %vm236_vm8, %v237_v11, %v235_v14  ;;  %v918_v19 = vpop.permute.xlu0 %917 }
 0x2fb   :  { %v246_v18 = vmax.f32 %v238_v15, 1e-12  ;;  %v1355_v20 = vpop.eup %1354  ;;  %v923_v22 = vmul.f32 %v918_v19, %v494_v16  ;;  %v924_v25 = vmul.f32 %v918_v19, %v495_v17 }
 0x2fc   :  { %v251_v28 = vmul.f32 %v1355_v20, %v1716_v21  ;;  %v779_v20 = vlaneseq }
 0x2fd   :  { %1356 = vrcp.f32 %v246_v18  ;;  %935 = vrot.lane.b32.xlu1 %v924_v25, %s1558_s23  ;;  %933 = vrot.lane.b32.xlu0 %v923_v22, %s1558_s23  ;;  %v992_v22 = vstv %s1213_s9 }
 0x2fe   :  { %v730_v32 = vmul.f32 %v726_v29, %v251_v28 }
 0x301   :  { %735 = vrot.lane.b32.xlu1 %v730_v32, %s1558_s23 }
 0x305   :  { %751 = vrot.lane.b32.xlu1 %v1808_v26, %s1557_s8  ;;  %v1207_v26 = vld [vmem:[%s1974_s6] ss:$0 sm:$0xff]  ;;  %s907_s6 = sld [smem:[#allocation7]] }
 0x306   :  { %v709_v12 = vmul.f32 %v1207_v26, %v701_v38  ;;  %v710_v52 = vmul.f32 %v1207_v26, %v702_v49  ;;  %v1002_v38 = vstv %s1214_s28 }
 0x307   :  { %v1357_v34 = vpop.eup %1356 }
 0x308   :  { %v250_v35 = vmul.f32 %v1357_v34, %v1728_v31  ;;  %v711_v43 = vsel %vm134_vm0, %v709_v12, 0.0  ;;  %v884_v31 = vmax.f32 %v1726_v30, 0.0  ;;  %v714_v53 = vsel %vm134_vm0, %v710_v52, 0.0 }
 0x309   :  { %v986_v34 = vstv %s1212_s26 }
 0x30a   :  { %v729_v36 = vmul.f32 %v724_v13, %v250_v35  ;;  %v894_v48 = vmul.f32 %v1211_v39, %v884_v31  ;;  %v780_v35 = vand.u32 127, %v779_v20 }
 0x30b   :  { %v908_v19 = vstv %s907_s6 }
 0x30c   :  { %733 = vrot.lane.b32.xlu0 %v729_v36, %s1558_s23  ;;  %v904_v51 = vsel %vm134_vm0, %v894_v48, 0.0  ;;  %v1019_v12 = vadd.s32 4294967288, %v780_v35 }
 0x310   :  { %749 = vrot.lane.b32.xlu0 %v1805_v23, %s1557_s8  ;;  %v891_v23 = vmul.f32 %v1211_v39, %v881_v41 }
 0x312   :  { %v895_v44 = vsel %vm134_vm0, %v891_v23, 0.0 }
 0x329   :  { %899 = vadd.xlane.f32.xlu1 %v898_v42  ;;  %v1860_v42 = vshrl.u32 %v779_v20, 7 }
 0x32d   :  { %712 = vadd.xlane.f32.xlu1 %v711_v43 }
 0x32f   :  { %896 = vadd.xlane.f32.xlu0 %v895_v44  ;;  %v962_v46 = vpop.permute.xlu0 %961  ;;  %v964_v30 = vpop.permute.xlu1 %963 }
 0x330   :  { %v973_v47 = vsel %vm134_vm0, %v962_v46, 0.0  ;;  %v976_v54 = vsel %vm134_vm0, %v964_v30, 0.0  ;;  %v1863_v46 = vsub.s32 %v780_v35, %v1860_v42 }
 0x331   :  { %974 = vadd.xlane.f32.xlu1 %v973_v47  ;;  %v1866_v47 = vsub.s32 %v1019_v12, %v1860_v42 }
 0x333   :  { %902 = vadd.xlane.f32.xlu0 %v901_v27  ;;  %v966_v33 = vpop.permute.xlu0 %965  ;;  %v968_v55 = vpop.permute.xlu1 %967 }
 0x334   :  { %v979_v50 = vsel %vm134_vm0, %v966_v33, 0.0  ;;  %v982_v56 = vsel %vm134_vm0, %v968_v55, 0.0 }
 0x335   :  { %980 = vadd.xlane.f32.xlu1 %v979_v50 }
 0x337   :  { %905 = vadd.xlane.f32.xlu0 %v904_v51 }
 0x33b   :  { %715 = vadd.xlane.f32.xlu0 %v714_v53 }
 0x33f   :  { %977 = vadd.xlane.f32.xlu0 %v976_v54 }
 0x343   :  { %983 = vadd.xlane.f32.xlu0 %v982_v56 }
 0x364   :  { %v932_v21 = vpop.permute.xlu1 %931  ;;  %v930_v57 = vpop.permute.xlu0 %929 }
 0x365   :  { %v944_v58 = vsel %vm134_vm0, %v932_v21, 0.0  ;;  %v941_v59 = vsel %vm134_vm0, %v930_v57, 0.0 }
 0x366   :  { %945 = vadd.xlane.f32.xlu0 %v944_v58  ;;  %942 = vadd.xlane.f32.xlu1 %v941_v59 }
 0x36f   :  { %v936_v60 = vpop.permute.xlu1 %935  ;;  %v934_v61 = vpop.permute.xlu0 %933 }
 0x370   :  { %v950_v62 = vsel %vm134_vm0, %v936_v60, 0.0  ;;  %v947_v63 = vsel %vm134_vm0, %v934_v61, 0.0 }
 0x371   :  { %951 = vadd.xlane.f32.xlu0 %v950_v62  ;;  %948 = vadd.xlane.f32.xlu1 %v947_v63  ;;  %v718_v63 = vstv %s717_s2 }
 0x373   :  { %v736_v0 = vpop.permute.xlu1 %735 }
 0x374   :  { %v742_v1 = vsel %vm134_vm0, %v736_v0, 0.0  ;;  %v766_v0 = vstv %s1872_s27 }
 0x375   :  { %743 = vadd.xlane.f32.xlu0 %v742_v1 }
 0x377   :  { %v752_v2 = vpop.permute.xlu1 %751 }
 0x378   :  { %v758_v3 = vsel %vm134_vm0, %v752_v2, 0.0 }
 0x379   :  { %759 = vadd.xlane.f32.xlu0 %v758_v3 }
 0x37e   :  { %v734_v4 = vpop.permute.xlu0 %733 }
 0x37f   :  { %v739_v5 = vsel %vm134_vm0, %v734_v4, 0.0  ;;  %v772_v4 = vstv %s1874_s12 }
 0x380   :  { %740 = vadd.xlane.f32.xlu1 %v739_v5 }
 0x382   :  { %v750_v6 = vpop.permute.xlu0 %749 }
 0x383   :  { %v755_v7 = vsel %vm134_vm0, %v750_v6, 0.0 }
 0x384   :  { %756 = vadd.xlane.f32.xlu1 %v755_v7 }
 0x3b6   :  { %v900_v10 = vpop.xlane.xlu1 %899 }
 0x3b7   :  { %v910_v29 = vadd.f32 %v908_v19, %v900_v10 }
 0x3b9   :  { %v988_v39 = vmul.f32 %v986_v34, %v910_v29 }
 0x3ba   :  { %v1856_v13 = vpop.xlane.xlu1 %712 }
 0x3bb   :  { %v719_v6 = vadd.f32 %v718_v63, %v1856_v13 }
 0x3bc   :  { %v897_v8 = vpop.xlane.xlu0 %896 }
 0x3bd   :  { %v909_v32 = vadd.f32 %v908_v19, %v897_v8  ;;  %v762_v8 = vstv %s1208_s13 }
 0x3be   :  { %v975_v15 = vpop.xlane.xlu1 %974 }
 0x3bf   :  { %v987_v40 = vmul.f32 %v986_v34, %v909_v32  ;;  %v1003_v43 = vmul.f32 %v1002_v38, %v975_v15  ;;  %v1559_v32 = vmov 0  }
 0x3c0   :  { %v903_v9 = vpop.xlane.xlu0 %902  ;;  %1285 = vset.pattern.permute.xlu0 %v1559_v32  ;;  %1284 = vset.pattern.permute.xlu1 %v1559_v32 }
 0x3c1   :  { %v911_v26 = vadd.f32 %v908_v19, %v903_v9 }
 0x3c2   :  { %v981_v17 = vpop.xlane.xlu1 %980 }
 0x3c3   :  { %v989_v45 = vmul.f32 %v986_v34, %v911_v26  ;;  %v1005_v52 = vmul.f32 %v1002_v38, %v981_v17 }
 0x3c4   :  { %v906_v11 = vpop.xlane.xlu0 %905 }
 0x3c5   :  { %v912_v41 = vadd.f32 %v908_v19, %v906_v11 }
 0x3c7   :  { %v990_v31 = vmul.f32 %v986_v34, %v912_v41  ;;  %v1895_v34 = vsub.s32 0, %v1860_v42 }
 0x3c8   :  { %v1858_v14 = vpop.xlane.xlu0 %715 }
 0x3c9   :  { %v720_v2 = vadd.f32 %v718_v63, %v1858_v14 }
 0x3cb   :  { %v764_v10 = vmul.f32 %v762_v8, %v720_v2 }
 0x3cc   :  { %v978_v16 = vpop.xlane.xlu0 %977 }
 0x3cd   :  { %v1004_v44 = vmul.f32 %v1002_v38, %v978_v16  ;;  %v763_v16 = vmul.f32 %v762_v8, %v719_v6 }
 0x3d0   :  { %v984_v18 = vpop.xlane.xlu0 %983 }
 0x3d1   :  { %v1006_v30 = vmul.f32 %v1002_v38, %v984_v18 }
 0x3f3   :  { %v943_v25 = vpop.xlane.xlu1 %942  ;;  %v946_v28 = vpop.xlane.xlu0 %945 }
 0x3f4   :  { %v993_v36 = vmul.f32 %v992_v22, %v943_v25  ;;  %v994_v37 = vmul.f32 %v992_v22, %v946_v28 }
 0x3f6   :  { %v997_v23 = vadd.f32 %v993_v36, %v987_v40  ;;  %v998_v24 = vadd.f32 %v994_v37, %v988_v39  ;;  %v1898_v36 = vsub.s32 1, %v1860_v42 }
 0x3f8   :  { %v1868_v49 = vadd.f32 %v1003_v43, %v997_v23  ;;  %v1870_v33 = vadd.f32 %v1004_v44, %v998_v24 }
 0x3fa   :  { %v1018_v55 = vrot.slane %v1868_v49, %v1863_v46  ;;  %v1023_v56 = vrot.slane %v1870_v33, %v1866_v47 }
 0x3fc   :  { %v1025_v61 = vsel %vm1024_vm9, %v1023_v56, %v1018_v55 }
 0x3fe   :  { %v949_v27 = vpop.xlane.xlu1 %948  ;;  %v952_v48 = vpop.xlane.xlu0 %951 }
 0x3ff   :  { %v995_v50 = vmul.f32 %v992_v22, %v949_v27  ;;  %v996_v51 = vmul.f32 %v992_v22, %v952_v48 }
 0x401   :  { %v999_v53 = vadd.f32 %v995_v50, %v989_v45  ;;  %v1000_v54 = vadd.f32 %v996_v51, %v990_v31 }
 0x402   :  { %v744_v58 = vpop.xlane.xlu0 %743 }
 0x403   :  { %v1009_v21 = vadd.f32 %v1005_v52, %v999_v53  ;;  %v1010_v57 = vadd.f32 %v1006_v30, %v1000_v54  ;;  %v768_v7 = vmul.f32 %v766_v0, %v744_v58 }
 0x405   :  { %v1029_v59 = vrot.slane %v1009_v21, %v1863_v46  ;;  %v1033_v60 = vrot.slane %v1010_v57, %v1866_v47  ;;  %v770_v17 = vadd.f32 %v768_v7, %v764_v10 }
 0x406   :  { %v760_v5 = vpop.xlane.xlu0 %759 }
 0x407   :  { %v1034_v62 = vsel %vm1024_vm9, %v1033_v60, %v1029_v59  ;;  %v774_v11 = vmul.f32 %v772_v4, %v760_v5 }
 0x408   :  { %v1035_v1 = vsel %vm789_vm10, %v1034_v62, %v1025_v61 }
 0x409   :  { %v1038_v3 = vsel %vm1037_vm11, %v1035_v1, -inf  ;;  %v776_v19 = vadd.f32 %v774_v11, %v770_v17  ;;  %v1374_v17 = vld [vmem:[#allocation8] sm:$0xff] }
 0x40a   :  { %1039 = vmax.xlane.f32.xlu1 %v1038_v3 }
 0x40b   :  { %v788_v25 = vrot.slane %v776_v19, %v1863_v46 }
 0x40d   :  { %v741_v9 = vpop.xlane.xlu1 %740 }
 0x40e   :  { %v767_v15 = vmul.f32 %v766_v0, %v741_v9 }
 0x410   :  { %v769_v20 = vadd.f32 %v767_v15, %v763_v16 }
 0x411   :  { %v757_v18 = vpop.xlane.xlu1 %756 }
 0x412   :  { %v773_v22 = vmul.f32 %v772_v4, %v757_v18 }
 0x414   :  { %v775_v14 = vadd.f32 %v773_v22, %v769_v20 }
 0x416   :  { %v784_v28 = vrot.slane %v775_v14, %v1863_v46 }
 0x418   :  { %v790_v13 = vsel %vm789_vm10, %v788_v25, %v784_v28 }
 0x419   :  { %v793_v29 = vsel %vm792_vm12, %v790_v13, -inf }
 0x41a   :  { %794 = vmax.xlane.f32.xlu0 %v793_v29 }
 0x497   :  { %v1040_v35 = vpop.xlane.xlu1 %1039 }
 0x498   :  { %v1045_v37 = vrot.slane %v1040_v35, %v1895_v34  ;;  %v1049_v12 = vrot.slane %v1040_v35, %v1898_v36 }
 0x49a   :  { %v1052_v23 = vsub.f32 %v1868_v49, %v1045_v37  ;;  %v1054_v44 = vsub.f32 %v1009_v21, %v1049_v12  ;;  %v1055_v42 = vsub.f32 %v1010_v57, %v1049_v12  ;;  %v1053_v56 = vsub.f32 %v1870_v33, %v1045_v37 }
 0x49c   :  { %v1056_v45 = vmul.f32 1.442695, %v1052_v23  ;;  %v1060_v31 = vmul.f32 1.442695, %v1054_v44  ;;  %v1062_v27 = vmul.f32 1.442695, %v1055_v42 }
 0x49d   :  { %v1058_v58 = vmul.f32 1.442695, %v1053_v56 }
 0x4a7   :  { %v795_v39 = vpop.xlane.xlu0 %794 }
 0x4a8   :  { %v800_v40 = vrot.slane %v795_v39, %v1895_v34  ;;  %v804_v38 = vrot.slane %v795_v39, %v1898_v36 }
 0x4aa   :  { %v807_v26 = vsub.f32 %v775_v14, %v800_v40  ;;  %v808_v41 = vsub.f32 %v776_v19, %v804_v38  ;;  %v1375_v14 = vld [vmem:[#allocation8 + $0x8] sm:$0xff] }
 0x4ac   :  { %v809_v24 = vmul.f32 1.442695, %v807_v26  ;;  %v811_v43 = vmul.f32 1.442695, %v808_v41 }
 0x4ae   :  { %1358 = vpow2.f32 %v809_v24 }
 0x4af   :  { %1360 = vpow2.f32 %v811_v43 }
 0x4b0   :  { %1362 = vpow2.f32 %v1056_v45 }
 0x4b1   :  { %1364 = vpow2.f32 %v1060_v31 }
 0x4b2   :  { %1366 = vpow2.f32 %v1062_v27 }
 0x4b3   :  { %1368 = vpow2.f32 %v1058_v58 }
 0x4b8   :  { %v1359_v48 = vpop.eup %1358 }
 0x4b9   :  { %v1361_v50 = vpop.eup %1360  ;;  %816 = vperm.xlu1 %1284, %v1359_v48  }
 0x4ba   :  { %819 = vperm.xlu0 %1285, %v1361_v50   ;;  %v1905_v51 = vpop.eup %1362 }
 0x4bb   :  { %v1908_v49 = vpop.eup %1364 }
 0x4bc   :  { %v1911_v52 = vpop.eup %1366 }
 0x4bd   :  { %v1369_v59 = vpop.eup %1368 }
 0x4be   :  { %1069 = vperm.xlu0 %1285, %v1905_v51  }
 0x4c2   :  { %1075 = vperm.xlu0 %1285, %v1908_v49  }
 0x4c6   :  { %1078 = vperm.xlu0 %1285, %v1911_v52  }
 0x538   :  { %v817_v30 = vpop.permute.xlu1 %816 }
 0x539   :  { %v820_v53 = vpop.permute.xlu0 %819  ;;  %v824_v54 = vrot.slane %v817_v30, %v1863_v46 }
 0x53a   :  { %v828_v55 = vrot.slane %v820_v53, %v1863_v46 }
 0x53c   :  { %v829_v21 = vsel %vm789_vm10, %v828_v55, %v824_v54 }
 0x53d   :  { %v831_v57 = vsel %vm792_vm12, %v829_v21, 0.0  ;;  %v1070_v33 = vpop.permute.xlu0 %1069 }
 0x53e   :  { %832 = vadd.xlane.f32.xlu1 %v831_v57  ;;  %v1083_v6 = vrot.slane %v1070_v33, %v1863_v46 }
 0x541   :  { %v1076_v2 = vpop.permute.xlu0 %1075 }
 0x542   :  { %v1092_v8 = vrot.slane %v1076_v2, %v1863_v46 }
 0x545   :  { %v1079_v4 = vpop.permute.xlu0 %1078 }
 0x546   :  { %v1096_v7 = vrot.slane %v1079_v4, %v1866_v47 }
 0x548   :  { %v1097_v10 = vsel %vm1024_vm9, %v1096_v7, %v1092_v8 }
 0x54f   :  { %1072 = vperm.xlu1 %1284, %v1369_v59  }
 0x5cb   :  { %v833_v60 = vpop.xlane.xlu1 %832 }
 0x5cc   :  { %1370 = vrcp.f32 %v833_v60 }
 0x5cf   :  { %v1073_v3 = vpop.permute.xlu1 %1072 }
 0x5d0   :  { %v1087_v5 = vrot.slane %v1073_v3, %v1866_v47 }
 0x5d2   :  { %v1088_v9 = vsel %vm1024_vm9, %v1087_v5, %v1083_v6 }
 0x5d3   :  { %v1098_v11 = vsel %vm789_vm10, %v1097_v10, %v1088_v9 }
 0x5d4   :  { %v1100_v15 = vsel %vm1037_vm11, %v1098_v11, 0.0 }
 0x5d6   :  { %v1371_v61 = vpop.eup %1370 }
 0x5d7   :  { %v839_v62 = vrot.slane %v1371_v61, %v1895_v34  ;;  %v843_v0 = vrot.slane %v1371_v61, %v1898_v36 }
 0x5d9   :  { %v846_v63 = vmul.f32 %v1359_v48, %v839_v62  ;;  %v847_v1 = vmul.f32 %v1361_v50, %v843_v0 }
 0x5db   :  { %850 = vperm.xlu0 %1285, %v846_v63  }
 0x5df   :  { %855 = vperm.xlu0 %1285, %v847_v1  }
 0x5fe   :  { %1101 = vadd.xlane.f32.xlu0 %v1100_v15 }
 0x65a   :  { %v851_v16 = vpop.permute.xlu0 %850 }
 0x65b   :  { %v858_v18 = vmul.f32 %v1374_v17, %v851_v16 }
 0x65d   :  { %v860_v19 = vsel %vm134_vm0, %v858_v18, 0.0 }
 0x65e   :  { %v861_v20 = vrot.slane %v860_v19, 4  ;;  %v856_v22 = vpop.permute.xlu0 %855 }
 0x65f   :  { %v859_v47 = vmul.f32 %v1375_v14, %v856_v22 }
 0x660   :  { %v862_v25 = vadd.f32 %v861_v20, %v860_v19 }
 0x661   :  { %v867_v46 = vsel %vm134_vm0, %v859_v47, 0.0 }
 0x662   :  { %v863_v28 = vrot.slane %v862_v25, 2  ;;  %v868_v13 = vrot.slane %v867_v46, 4 }
 0x664   :  { %v864_v29 = vadd.f32 %v863_v28, %v862_v25  ;;  %v869_v32 = vadd.f32 %v868_v13, %v867_v46 }
 0x666   :  { %v870_v35 = vrot.slane %v869_v32, 2  ;;  %v865_v37 = vrot.slane %v864_v29, 1 }
 0x668   :  { %v871_v39 = vadd.f32 %v870_v35, %v869_v32  ;;  %v866_v38 = vadd.f32 %v865_v37, %v864_v29 }
 0x66a   :  { %v872_v40 = vrot.slane %v871_v39, 1 }
 0x66c   :  { %v873_v26 = vadd.f32 %v872_v40, %v871_v39 }
 0x66e   :  { %v876_v41 = vsel %vm789_vm10, %v873_v26, %v866_v38 }
 0x66f   :  { %879 = vst.msk [vmem:[#allocation14] sm:$0x3] %vm878_vm13, %v876_v41 }
 0x68b   :  { %v1102_v12 = vpop.xlane.xlu0 %1101 }
 0x68c   :  { %1372 = vrcp.f32 %v1102_v12 }
 0x696   :  { %v1373_v23 = vpop.eup %1372 }
 0x697   :  { %v1108_v24 = vrot.slane %v1373_v23, %v1895_v34  ;;  %v1112_v45 = vrot.slane %v1373_v23, %v1898_v36 }
 0x699   :  { %v1115_v43 = vmul.f32 %v1905_v51, %v1108_v24  ;;  %v1116_v44 = vmul.f32 %v1369_v59, %v1108_v24  ;;  %v1117_v42 = vmul.f32 %v1908_v49, %v1112_v45  ;;  %v1118_v31 = vmul.f32 %v1911_v52, %v1112_v45 }
 0x69b   :  { %1121 = vperm.xlu1 %1284, %v1115_v43  }
 0x69f   :  { %1126 = vperm.xlu1 %1284, %v1116_v44  }
 0x6a3   :  { %1131 = vperm.xlu1 %1284, %v1117_v42  }
 0x6a7   :  { %1136 = vperm.xlu1 %1284, %v1118_v31  }
 0x6a8   :  { %1501 = shalt.err (!%p1498_p2)
}
 0x6a9   :  { %s1502_s21 = scalar_lea.hbm %s1978_s10, 32 }
 0x6aa   :  { %p1503_p3 = scmp.ne.s32.totalorder %s1978_s10, %s1502_s21  ;;  %p1506_p4 = scmp.lt.u32.totalorder %s1502_s21, %s1978_s10 }
 0x6ac   :  { %p1508_p5 = pnand %p1506_p4, %p1503_p3 }
 0x6ae   :  { %1511 = shalt.err (!%p1508_p5)
}
 0x6af   :  { %1175 = dma.vmem_to_hbm [thread:$0]  %s1173_s14, 32, %s1978_s10, [#allocation4]   ;;  %v1376_v36 = vld [vmem:[#allocation9] sm:$0xff]  ;;  %v1377_v50 = vld [vmem:[#allocation9 + $0x8] sm:$0xff]  ;;  %v1378_v55 = vld [vmem:[#allocation9 + $0x10] sm:$0xff] }
 0x6b0   :  { %v1379_v58 = vld [vmem:[#allocation9 + $0x18] sm:$0xff]  ;;  %s1561_s10 = smov [#allocation15]  }
 0x6b1   :  { %s1182_s30 = sshll.u32 %s1561_s10, 4  ;;  %s1183_s30 = int_to_ptr.vmem [resolvable:$true] %s1182_s30 }
 0x6b2   :  { %s1512_s22 = scalar_lea.vmem %s1183_s30, 32  ;;  %p1517_p7 = scmp.lt.s32.totalorder %s1183_s30, %s1183_s30 }
 0x6b3   :  { %p1513_p6 = scmp.ne.s32.totalorder %s1183_s30, %s1512_s22  ;;  %p1518_p8 = scmp.lt.s32.totalorder %s1512_s22, %s1512_s22 }
 0x6b5   :  { %p1519_p9 = por %p1518_p8, %p1517_p7 }
 0x6b7   :  { %p1520_p10 = pnand %p1519_p9, %p1513_p6 }
 0x71a   :  { %v1122_v34 = vpop.permute.xlu1 %1121 }
 0x71b   :  { %v1139_v27 = vmul.f32 %v1376_v36, %v1122_v34 }
 0x71d   :  { %v1143_v49 = vsel %vm134_vm0, %v1139_v27, 0.0 }
 0x71e   :  { %v1127_v48 = vpop.permute.xlu1 %1126 }
 0x71f   :  { %v1140_v51 = vmul.f32 %v1377_v50, %v1127_v48 }
 0x721   :  { %v1144_v52 = vsel %vm134_vm0, %v1140_v51, 0.0 }
 0x722   :  { %v1145_v30 = vadd.f32 %v1144_v52, %v1143_v49  ;;  %v1132_v53 = vpop.permute.xlu1 %1131 }
 0x723   :  { %v1141_v56 = vmul.f32 %v1378_v55, %v1132_v53 }
 0x724   :  { %v1146_v54 = vrot.slane %v1145_v30, 4 }
 0x725   :  { %v1152_v60 = vsel %vm134_vm0, %v1141_v56, 0.0 }
 0x726   :  { %v1147_v21 = vadd.f32 %v1146_v54, %v1145_v30  ;;  %v1137_v57 = vpop.permute.xlu1 %1136 }
 0x727   :  { %v1142_v59 = vmul.f32 %v1379_v58, %v1137_v57 }
 0x728   :  { %v1148_v62 = vrot.slane %v1147_v21, 2 }
 0x729   :  { %v1153_v61 = vsel %vm134_vm0, %v1142_v59, 0.0 }
 0x72a   :  { %v1154_v63 = vadd.f32 %v1153_v61, %v1152_v60  ;;  %v1149_v1 = vadd.f32 %v1148_v62, %v1147_v21 }
 0x72c   :  { %v1155_v0 = vrot.slane %v1154_v63, 4  ;;  %v1150_v4 = vrot.slane %v1149_v1, 1 }
 0x72e   :  { %v1156_v33 = vadd.f32 %v1155_v0, %v1154_v63  ;;  %v1151_v6 = vadd.f32 %v1150_v4, %v1149_v1 }
 0x730   :  { %v1157_v2 = vrot.slane %v1156_v33, 2 }
 0x732   :  { %v1158_v3 = vadd.f32 %v1157_v2, %v1156_v33 }
 0x734   :  { %v1159_v5 = vrot.slane %v1158_v3, 1 }
 0x736   :  { %v1160_v7 = vadd.f32 %v1159_v5, %v1158_v3 }
 0x738   :  { %v1163_v8 = vsel %vm789_vm10, %v1160_v7, %v1151_v6 }
 0x739   :  { %1165 = vst.msk [vmem:[#allocation15] sm:$0x3] %vm878_vm13, %v1163_v8 }
 0x73a   :  { %1523 = shalt.err (!%p1520_p10)
}
 0x73b   :  { %s1524_s23 = scalar_lea.hbm %s1979_s11, 32 }
 0x73c   :  { %p1525_p11 = scmp.ne.s32.totalorder %s1979_s11, %s1524_s23  ;;  %p1528_p12 = scmp.lt.u32.totalorder %s1524_s23, %s1979_s11 }
 0x73e   :  { %p1530_p13 = pnand %p1528_p12, %p1525_p11 }
 0x740   :  { %1533 = shalt.err (!%p1530_p13)
}
 0x741   :  { %1185 = dma.vmem_to_hbm [thread:$0]  %s1183_s30, 32, %s1979_s11, [#allocation16]  }
 0x742   :  { %1544 = dma.done.wait [#allocation4], 32  }
 0x743   :  { %1545 = vsyncadd [#allocation4], 4294967264 }
 0x744   :  { %1546 = dma.done.wait [#allocation16], 32  }
 0x745   :  { %1547 = vsyncadd [#allocation16], 4294967264 }
 0x746   :  { %1192 = vsyncpa [#allocation3], 1 }
 0x747   :  { %1193 = vsyncpa [#allocation10], 1 }
 0x748   :  { %1194 = vsyncpa [#allocation13], 1 }
 0x749   :  { %1195 = vsyncpa [#allocation4], 1 }
 0x74a   :  { %1196 = vsyncpa [#allocation16], 1 }
 0x74b   :  { %1197 = vsyncpa [#allocation5], 1 }
 0x74c   :  { %1198 = vsyncpa [#allocation6], 1 }

</bundles_post_ra>
